<compile_context>
chip_gen: v6e
topology: v6e:2x2x1
jax: 0.10.0
libtpu: 0.0.40
codegen_flags: <defaults>
</compile_context>

<pallas_src>
import functools

import jax
import jax.numpy as jnp
from jax.experimental import pallas as pl
from jax.experimental.pallas import tpu as pltpu


LANE = 128
# Conservative VMEM budgets that fit the 32 MiB default scoped VMEM on v5e/v6e/v7x
# (leaving headroom for double-buffered tiles; v7x only has 64 MiB physical).
_FUSED_VMEM_BUDGET = 20 * 1024 * 1024      # whole-problem-resident fused path
_RESIDENT_B_BUDGET = 4 * 1024 * 1024       # embedding operand resident in the tiled path


# ----------------------------- tile selection helpers -----------------------------

def _pick_tm(m):
    # Largest of {512, 256, 128} dividing m while keeping >=2 blocks on the parallel
    # (row) axis so both v7x TensorCores get work; fall back to the full extent.
    for t in (512, 256, 128):
        if m % t == 0 and m // t >= 2:
            return t
    return m


def _pick_tk(k):
    # Largest of {512, 256, 128} dividing k; fall back to the full extent.
    for t in (512, 256, 128):
        if k % t == 0:
            return t
    return k


# ----------------------------- fused small-graph kernel -----------------------------

def _fused_forward_kernel(adj_ref, ego0_ref, final_ref, ego_scr, acc_scr, *, n_layers):
    # Everything (adjacency, embeddings, accumulator) is VMEM-resident for the whole call.
    ego_scr[...] = ego0_ref[...]
    acc_scr[...] = jnp.zeros_like(acc_scr)
    # n_layers is a small static python int -> fully unrolled (LLO-visible).
    for _ in range(n_layers):
        nxt = jnp.dot(adj_ref[...], ego_scr[...], preferred_element_type=jnp.float32)
        acc_scr[...] = acc_scr[...] + nxt
        ego_scr[...] = nxt.astype(ego_scr.dtype)
    final_ref[...] = acc_scr[...] * (1.0 / float(n_layers))


def lightgcn_fused_forward(adj, ego0, n_layers):
    """Single-kernel LightGCN forward for graphs whose adjacency fits in VMEM.

    adj  : [N, N] (bf16 recommended)
    ego0 : [N, D]
    Returns the layer-mean embeddings [N, D] in float32.
    """
    n, n2 = adj.shape
    n3, d = ego0.shape
    assert n == n2 == n3

    kernel = functools.partial(_fused_forward_kernel, n_layers=n_layers)
    return pl.pallas_call(
        kernel,
        out_shape=jax.ShapeDtypeStruct((n, d), jnp.float32),
        grid_spec=pltpu.PrefetchScalarGridSpec(
            num_scalar_prefetch=0,
            grid=(1,),
            in_specs=[
                pl.BlockSpec((n, n), lambda i: (0, 0)),   # adjacency, DMA'd exactly once
                pl.BlockSpec((n, d), lambda i: (0, 0)),   # initial ego embeddings
            ],
            out_specs=pl.BlockSpec((n, d), lambda i: (0, 0)),
            scratch_shapes=[
                pltpu.VMEM((n, d), ego0.dtype),           # current-layer ego (bf16)
                pltpu.VMEM((n, d), jnp.float32),          # running layer-sum (f32)
            ],
        ),
        compiler_params=pltpu.CompilerParams(
            dimension_semantics=("arbitrary",),
        ),
        cost_estimate=pl.CostEstimate(
            flops=2 * n * n * d * n_layers,
            transcendentals=0,
            bytes_accessed=n * n * adj.dtype.itemsize + 2 * n * d * 4,
        ),
    )(adj, ego0)


# ----------------------------- tiled large-graph layer step -----------------------------

def _layer_step_kernel(a_ref, b_ref, prev_ref, ego_ref, acc_ref, partial_ref,
                       *, tk, b_resident):
    # grid = (M // tm, K // tk); reduction axis (k) last.
    k = pl.program_id(1)

    @pl.when(k == 0)
    def _():
        partial_ref[...] = jnp.zeros_like(partial_ref)

    if b_resident:
        # Embedding operand is fully VMEM-resident; slice the current K-chunk out of it.
        off = pl.multiple_of(k * tk, tk)
        b_blk = b_ref[pl.ds(off, tk), :]
    else:
        b_blk = b_ref[...]

    partial_ref[...] += jnp.dot(a_ref[...], b_blk, preferred_element_type=jnp.float32)

    @pl.when(k == pl.num_programs(1) - 1)
    def _():
        # Fused epilogue: next-layer ego (bf16 for the next matmul) + running f32 layer-sum.
        ego_ref[...] = partial_ref[...].astype(ego_ref.dtype)
        acc_ref[...] = prev_ref[...] + partial_ref[...]


def lightgcn_layer_step(adj, ego, acc_prev):
    """One LightGCN propagation layer:
         ego_next = adj @ ego            (bf16 inputs, f32 MXU accumulation)
         acc_next = acc_prev + ego_next  (f32 running layer-sum, fused into the epilogue)
    """
    m, k = adj.shape
    k2, d = ego.shape
    assert k == k2 and acc_prev.shape == (m, d)
    assert m % LANE == 0 and k % LANE == 0 and d % LANE == 0, (
        "tiled path expects node count / emb size padded to multiples of 128")

    tm = _pick_tm(m)
    tk = _pick_tk(k)
    grid = (m // tm, k // tk)

    # Keep the embedding operand resident in VMEM (DMA'd once) when it comfortably fits;
    # otherwise stream (tk, D) chunks.
    b_resident = k * d * ego.dtype.itemsize <= _RESIDENT_B_BUDGET
    if b_resident:
        b_spec = pl.BlockSpec((k, d), lambda i, kk: (0, 0))
    else:
        b_spec = pl.BlockSpec((tk, d), lambda i, kk: (kk, 0))

    kernel = functools.partial(_layer_step_kernel, tk=tk, b_resident=b_resident)

    bytes_accessed = (
        m * k * adj.dtype.itemsize                                           # adjacency (once)
        + k * d * ego.dtype.itemsize * (1 if b_resident else (m // tm))      # embeddings
        + m * d * 4                                                          # prev layer-sum
        + m * d * (ego.dtype.itemsize + 4)                                   # two outputs
    )

    return pl.pallas_call(
        kernel,
        out_shape=(
            jax.ShapeDtypeStruct((m, d), ego.dtype),      # ego_next
            jax.ShapeDtypeStruct((m, d), jnp.float32),    # acc_next
        ),
        grid_spec=pltpu.PrefetchScalarGridSpec(
            num_scalar_prefetch=0,
            grid=grid,
            in_specs=[
                pl.BlockSpec((tm, tk), lambda i, kk: (i, kk)),
                b_spec,
                pl.BlockSpec((tm, d), lambda i, kk: (i, 0)),
            ],
            out_specs=[
                pl.BlockSpec((tm, d), lambda i, kk: (i, 0)),
                pl.BlockSpec((tm, d), lambda i, kk: (i, 0)),
            ],
            scratch_shapes=[pltpu.VMEM((tm, d), jnp.float32)],
        ),
        compiler_params=pltpu.CompilerParams(
            dimension_semantics=("parallel", "arbitrary"),
        ),
        cost_estimate=pl.CostEstimate(
            flops=2 * m * k * d,
            transcendentals=0,
            bytes_accessed=bytes_accessed,
        ),
    )(adj, ego, acc_prev)


# ----------------------------- LightGCN encoder forward -----------------------------

def _fused_path_vmem_bytes(n, d):
    # Rough VMEM footprint of the fused kernel (pessimistically x2 for buffering of I/O blocks).
    return 2 * (n * n * 2) + 2 * (n * d * 2) + 2 * (n * d * 4) + n * d * (2 + 4)


def lightgcn_forward(norm_adj, user_emb, item_emb, n_layers, *, force_tiled=False):
    """Forward pass of LightGCN_Encoder.

    norm_adj : [N, N] dense normalized adjacency (N = U + I)
    user_emb : [U, D]
    item_emb : [I, D]
    Returns (user_all_embeddings [U, D], item_all_embeddings [I, D]) in float32.
    """
    u = user_emb.shape[0]
    n = norm_adj.shape[0]
    d = user_emb.shape[1]

    # Cast the matmul operands to bf16 ONCE (outside the layer loop); accumulate in f32.
    adj_bf16 = norm_adj.astype(jnp.bfloat16)
    ego = jnp.concatenate([user_emb, item_emb], axis=0).astype(jnp.bfloat16)   # [N, D]

    use_fused = (not force_tiled) and _fused_path_vmem_bytes(n, d) <= _FUSED_VMEM_BUDGET

    if use_fused:
        final = lightgcn_fused_forward(adj_bf16, ego, n_layers)
    else:
        acc = jnp.zeros((n, d), jnp.float32)
        for _ in range(n_layers):
            ego, acc = lightgcn_layer_step(adj_bf16, ego, acc)
        final = acc / jnp.float32(n_layers)

    # == mean(stack(all_embeddings, dim=1), dim=1); the module averages only the
    # n_layers *propagated* outputs (layer-0 ego is not included), matching the spec.
    return final[:u], final[u:]


# ----------------------------- deterministic setup helpers -----------------------------

def xavier_uniform(key, shape):
    fan_in, fan_out = shape
    limit = jnp.sqrt(6.0 / (fan_in + fan_out))
    return jax.random.uniform(key, shape, jnp.float32, -limit, limit)


def build_norm_adj(key, user_num, item_num):
    """Synthetic symmetric-normalized bipartite adjacency D^{-1/2} A D^{-1/2}, dense."""
    n = user_num + item_num
    r = (jax.random.uniform(key, (user_num, item_num)) < 0.05).astype(jnp.float32)
    a = jnp.zeros((n, n), jnp.float32)
    a = a.at[:user_num, user_num:].set(r)
    a = a.at[user_num:, :user_num].set(r.T)
    deg = jnp.sum(a, axis=1)
    d_inv_sqrt = jnp.where(deg > 0, 1.0 / jnp.sqrt(jnp.maximum(deg, 1e-12)), 0.0)
    return a * d_inv_sqrt[:, None] * d_inv_sqrt[None, :]


# ----------------------------- main -----------------------------

if __name__ == "__main__":
    # Small shapes consistent with the module; N and D tileable by 128.
    user_num, item_num, emb_size, n_layers = 128, 128, 128, 3
    N = user_num + item_num

    key = jax.random.PRNGKey(0)
    k_u, k_i, k_a = jax.random.split(key, 3)

    user_emb = xavier_uniform(k_u, (user_num, emb_size))
    item_emb = xavier_uniform(k_i, (item_num, emb_size))
    norm_adj = build_norm_adj(k_a, user_num, item_num)

    fwd_fused = jax.jit(functools.partial(lightgcn_forward, n_layers=n_layers))
    fwd_tiled = jax.jit(functools.partial(lightgcn_forward, n_layers=n_layers, force_tiled=True))

    u_f, i_f = fwd_fused(norm_adj, user_emb, item_emb)
    u_t, i_t = fwd_tiled(norm_adj, user_emb, item_emb)
    jax.block_until_ready((u_f, i_f, u_t, i_t))

    # Reference that emulates the kernels' precision (bf16 operands, f32 accumulation).
    adj_bf = norm_adj.astype(jnp.bfloat16)
    ego_bf = jnp.concatenate([user_emb, item_emb], axis=0).astype(jnp.bfloat16)
    acc = jnp.zeros((N, emb_size), jnp.float32)
    for _ in range(n_layers):
        nxt = jnp.dot(adj_bf, ego_bf, preferred_element_type=jnp.float32)
        acc = acc + nxt
        ego_bf = nxt.astype(jnp.bfloat16)
    ref_bf = acc / n_layers

    for (uo, io) in ((u_f, i_f), (u_t, i_t)):
        out = jnp.concatenate([uo, io], axis=0)
        assert out.shape == (N, emb_size)
        assert jnp.allclose(out, ref_bf, atol=1e-4, rtol=1e-3), float(
            jnp.max(jnp.abs(out - ref_bf)))

    # Loose sanity check against the full-f32 reference (bf16 adjacency => small relative error).
    ego32 = jnp.concatenate([user_emb, item_emb], axis=0)
    acc32 = jnp.zeros_like(ego32)
    for _ in range(n_layers):
        ego32 = norm_adj @ ego32
        acc32 = acc32 + ego32
    ref32 = acc32 / n_layers
    out_f = jnp.concatenate([u_f, i_f], axis=0)
    assert jnp.allclose(out_f, ref32, atol=5e-3, rtol=5e-2)
    assert u_f.shape == (user_num, emb_size) and i_f.shape == (item_num, emb_size)

    print("KERNEL_OK")
</pallas_src>

<mosaic_0001>
module attributes {stable_mosaic.version = 11 : i64} {
  func.func @_fused_forward_kernel(%arg0: i32, %arg1: memref<256x256xbf16, #tpu.memory_space<vmem>>, %arg2: memref<256x128xbf16, #tpu.memory_space<vmem>>, %arg3: memref<256x128xf32, #tpu.memory_space<vmem>>, %arg4: memref<256x128xbf16, #tpu.memory_space<vmem>>, %arg5: memref<256x128xf32, #tpu.memory_space<vmem>>) attributes {dimension_semantics = [#tpu.dimension_semantics<arbitrary>], iteration_bounds = array<i64: 1>, scalar_prefetch = 0 : i64, scratch_operands = 2 : i64, tpu.core_type = #tpu.core_type<tc>, window_params = [{pipeline_mode = #tpu.pipeline_mode<synchronous>, transform_indices = @transform_0, window_bounds = array<i64: 256, 256>}, {pipeline_mode = #tpu.pipeline_mode<synchronous>, transform_indices = @transform_1, window_bounds = array<i64: 256, 128>}, {pipeline_mode = #tpu.pipeline_mode<synchronous>, transform_indices = @transform_2, window_bounds = array<i64: 256, 128>}]} {
    %c0 = arith.constant 0 : index
    %c0_0 = arith.constant 0 : index
    %0 = vector.load %arg2[%c0, %c0_0] : memref<256x128xbf16, #tpu.memory_space<vmem>>, vector<256x128xbf16>
    %c0_1 = arith.constant 0 : index
    %c0_2 = arith.constant 0 : index
    %1 = vector.load %arg4[%c0_1, %c0_2] : memref<256x128xbf16, #tpu.memory_space<vmem>>, vector<256x128xbf16>
    tpu.vector_store %arg4[%c0_1, %c0_2], %0 {strides = array<i32>} : memref<256x128xbf16, #tpu.memory_space<vmem>>, vector<256x128xbf16>,
    %cst = arith.constant 0.000000e+00 : f32
    %2 = vector.broadcast %cst : f32 to vector<256x128xf32>
    %c0_3 = arith.constant 0 : index
    %c0_4 = arith.constant 0 : index
    %3 = vector.load %arg5[%c0_3, %c0_4] : memref<256x128xf32, #tpu.memory_space<vmem>>, vector<256x128xf32>
    tpu.vector_store %arg5[%c0_3, %c0_4], %2 {strides = array<i32>} : memref<256x128xf32, #tpu.memory_space<vmem>>, vector<256x128xf32>,
    %c0_5 = arith.constant 0 : index
    %c0_6 = arith.constant 0 : index
    %4 = vector.load %arg1[%c0_5, %c0_6] : memref<256x256xbf16, #tpu.memory_space<vmem>>, vector<256x256xbf16>
    %c0_7 = arith.constant 0 : index
    %c0_8 = arith.constant 0 : index
    %5 = vector.load %arg4[%c0_7, %c0_8] : memref<256x128xbf16, #tpu.memory_space<vmem>>, vector<256x128xbf16>
    %cst_9 = arith.constant dense<0.000000e+00> : vector<256x128xf32>
    %6 = tpu.matmul %4, %5, %cst_9 {dimension_numbers = #tpu.dot_dimension_numbers<[1], [0], [0], [1], [0, 0, 1, 1], [], []>} : vector<256x256xbf16>, vector<256x128xbf16>, vector<256x128xf32> -> vector<256x128xf32>
    %c0_10 = arith.constant 0 : index
    %c0_11 = arith.constant 0 : index
    %7 = vector.load %arg5[%c0_10, %c0_11] : memref<256x128xf32, #tpu.memory_space<vmem>>, vector<256x128xf32>
    %8 = arith.addf %7, %6 : vector<256x128xf32>
    %c0_12 = arith.constant 0 : index
    %c0_13 = arith.constant 0 : index
    %9 = vector.load %arg5[%c0_12, %c0_13] : memref<256x128xf32, #tpu.memory_space<vmem>>, vector<256x128xf32>
    tpu.vector_store %arg5[%c0_12, %c0_13], %8 {strides = array<i32>} : memref<256x128xf32, #tpu.memory_space<vmem>>, vector<256x128xf32>,
    %10 = arith.truncf %6 : vector<256x128xf32> to vector<256x128xbf16>
    %c0_14 = arith.constant 0 : index
    %c0_15 = arith.constant 0 : index
    %11 = vector.load %arg4[%c0_14, %c0_15] : memref<256x128xbf16, #tpu.memory_space<vmem>>, vector<256x128xbf16>
    tpu.vector_store %arg4[%c0_14, %c0_15], %10 {strides = array<i32>} : memref<256x128xbf16, #tpu.memory_space<vmem>>, vector<256x128xbf16>,
    %c0_16 = arith.constant 0 : index
    %c0_17 = arith.constant 0 : index
    %12 = vector.load %arg1[%c0_16, %c0_17] : memref<256x256xbf16, #tpu.memory_space<vmem>>, vector<256x256xbf16>
    %c0_18 = arith.constant 0 : index
    %c0_19 = arith.constant 0 : index
    %13 = vector.load %arg4[%c0_18, %c0_19] : memref<256x128xbf16, #tpu.memory_space<vmem>>, vector<256x128xbf16>
    %cst_20 = arith.constant dense<0.000000e+00> : vector<256x128xf32>
    %14 = tpu.matmul %12, %13, %cst_20 {dimension_numbers = #tpu.dot_dimension_numbers<[1], [0], [0], [1], [0, 0, 1, 1], [], []>} : vector<256x256xbf16>, vector<256x128xbf16>, vector<256x128xf32> -> vector<256x128xf32>
    %c0_21 = arith.constant 0 : index
    %c0_22 = arith.constant 0 : index
    %15 = vector.load %arg5[%c0_21, %c0_22] : memref<256x128xf32, #tpu.memory_space<vmem>>, vector<256x128xf32>
    %16 = arith.addf %15, %14 : vector<256x128xf32>
    %c0_23 = arith.constant 0 : index
    %c0_24 = arith.constant 0 : index
    %17 = vector.load %arg5[%c0_23, %c0_24] : memref<256x128xf32, #tpu.memory_space<vmem>>, vector<256x128xf32>
    tpu.vector_store %arg5[%c0_23, %c0_24], %16 {strides = array<i32>} : memref<256x128xf32, #tpu.memory_space<vmem>>, vector<256x128xf32>,
    %18 = arith.truncf %14 : vector<256x128xf32> to vector<256x128xbf16>
    %c0_25 = arith.constant 0 : index
    %c0_26 = arith.constant 0 : index
    %19 = vector.load %arg4[%c0_25, %c0_26] : memref<256x128xbf16, #tpu.memory_space<vmem>>, vector<256x128xbf16>
    tpu.vector_store %arg4[%c0_25, %c0_26], %18 {strides = array<i32>} : memref<256x128xbf16, #tpu.memory_space<vmem>>, vector<256x128xbf16>,
    %c0_27 = arith.constant 0 : index
    %c0_28 = arith.constant 0 : index
    %20 = vector.load %arg1[%c0_27, %c0_28] : memref<256x256xbf16, #tpu.memory_space<vmem>>, vector<256x256xbf16>
    %c0_29 = arith.constant 0 : index
    %c0_30 = arith.constant 0 : index
    %21 = vector.load %arg4[%c0_29, %c0_30] : memref<256x128xbf16, #tpu.memory_space<vmem>>, vector<256x128xbf16>
    %cst_31 = arith.constant dense<0.000000e+00> : vector<256x128xf32>
    %22 = tpu.matmul %20, %21, %cst_31 {dimension_numbers = #tpu.dot_dimension_numbers<[1], [0], [0], [1], [0, 0, 1, 1], [], []>} : vector<256x256xbf16>, vector<256x128xbf16>, vector<256x128xf32> -> vector<256x128xf32>
    %c0_32 = arith.constant 0 : index
    %c0_33 = arith.constant 0 : index
    %23 = vector.load %arg5[%c0_32, %c0_33] : memref<256x128xf32, #tpu.memory_space<vmem>>, vector<256x128xf32>
    %24 = arith.addf %23, %22 : vector<256x128xf32>
    %c0_34 = arith.constant 0 : index
    %c0_35 = arith.constant 0 : index
    %25 = vector.load %arg5[%c0_34, %c0_35] : memref<256x128xf32, #tpu.memory_space<vmem>>, vector<256x128xf32>
    tpu.vector_store %arg5[%c0_34, %c0_35], %24 {strides = array<i32>} : memref<256x128xf32, #tpu.memory_space<vmem>>, vector<256x128xf32>,
    %26 = arith.truncf %22 : vector<256x128xf32> to vector<256x128xbf16>
    %c0_36 = arith.constant 0 : index
    %c0_37 = arith.constant 0 : index
    %27 = vector.load %arg4[%c0_36, %c0_37] : memref<256x128xbf16, #tpu.memory_space<vmem>>, vector<256x128xbf16>
    tpu.vector_store %arg4[%c0_36, %c0_37], %26 {strides = array<i32>} : memref<256x128xbf16, #tpu.memory_space<vmem>>, vector<256x128xbf16>,
    %c0_38 = arith.constant 0 : index
    %c0_39 = arith.constant 0 : index
    %28 = vector.load %arg5[%c0_38, %c0_39] : memref<256x128xf32, #tpu.memory_space<vmem>>, vector<256x128xf32>
    %cst_40 = arith.constant 0.333333343 : f32
    %29 = vector.broadcast %cst_40 : f32 to vector<256x128xf32>
    %30 = arith.mulf %28, %29 : vector<256x128xf32>
    %c0_41 = arith.constant 0 : index
    %c0_42 = arith.constant 0 : index
    %31 = vector.load %arg3[%c0_41, %c0_42] : memref<256x128xf32, #tpu.memory_space<vmem>>, vector<256x128xf32>
    tpu.vector_store %arg3[%c0_41, %c0_42], %30 {strides = array<i32>} : memref<256x128xf32, #tpu.memory_space<vmem>>, vector<256x128xf32>,
    return
  }
  func.func @transform_0(%arg0: i32) -> (i32, i32) {
    %c0_i32 = arith.constant 0 : i32
    %c0_i32_0 = arith.constant 0 : i32
    %c0_i32_1 = arith.constant 0 : i32
    return %c0_i32, %c0_i32_0 : i32, i32
  }
  func.func @transform_1(%arg0: i32) -> (i32, i32) {
    %c0_i32 = arith.constant 0 : i32
    %c0_i32_0 = arith.constant 0 : i32
    %c0_i32_1 = arith.constant 0 : i32
    return %c0_i32, %c0_i32_0 : i32, i32
  }
  func.func @transform_2(%arg0: i32) -> (i32, i32) {
    %c0_i32 = arith.constant 0 : i32
    %c0_i32_0 = arith.constant 0 : i32
    %c0_i32_1 = arith.constant 0 : i32
    return %c0_i32, %c0_i32_0 : i32, i32
  }
}

</mosaic_0001>

<bundles_post_ra>
// kernel: lightgcn_forward.1
= control target key start
LH: loop header
LB: loop body
LE: loop exit
PB: predicated region body
PF: predicated region fallthrough
CT: control target
= control target key end

     0   :  { %s4271_s1 = inlined_call_operand.vmem [shape: bf16[256,128], index: 1, kind: input, shape index: {}]   ;;  %s4272_s0 = inlined_call_operand.vmem [shape: bf16[256,256], index: 0, kind: input, shape index: {}]   ;;  %s4273_s2 = inlined_call_operand.vmem [shape: f32[256,128], index: 2, kind: output, shape index: {}]  }
   0x1   :  { %v42_v0 = vld [vmem:[%s4271_s1 + $0x78] sm:$0xff]   ;;  %v40_v2 = vld [vmem:[%s4271_s1 + $0x70] sm:$0xff]   ;;  %v38_v4 = vld [vmem:[%s4271_s1 + $0x68] sm:$0xff]  }
   0x2   :  { %v26_v1 = vld [vmem:[%s4271_s1 + $0x38] sm:$0xff]   ;;  %74 = vst [vmem:[#allocation2 + $0x78] sm:$0xff] %v42_v0   ;;  %72 = vst [vmem:[#allocation2 + $0x70] sm:$0xff] %v40_v2   ;;  %v24_v3 = vld [vmem:[%s4271_s1 + $0x30] sm:$0xff]  }
   0x3   :  { %58 = vst [vmem:[#allocation2 + $0x38] sm:$0xff] %v26_v1   ;;  %v22_v5 = vld [vmem:[%s4271_s1 + $0x28] sm:$0xff]   ;;  %56 = vst [vmem:[#allocation2 + $0x30] sm:$0xff] %v24_v3   ;;  %v36_v6 = vld [vmem:[%s4271_s1 + $0x60] sm:$0xff]  }
   0x4   :  { %70 = vst [vmem:[#allocation2 + $0x68] sm:$0xff] %v38_v4   ;;  %54 = vst [vmem:[#allocation2 + $0x28] sm:$0xff] %v22_v5   ;;  %v20_v7 = vld [vmem:[%s4271_s1 + $0x20] sm:$0xff]   ;;  %v34_v8 = vld [vmem:[%s4271_s1 + $0x58] sm:$0xff]  }
   0x5   :  { %68 = vst [vmem:[#allocation2 + $0x60] sm:$0xff] %v36_v6   ;;  %52 = vst [vmem:[#allocation2 + $0x20] sm:$0xff] %v20_v7   ;;  %v18_v9 = vld [vmem:[%s4271_s1 + $0x18] sm:$0xff]   ;;  %v32_v10 = vld [vmem:[%s4271_s1 + $0x50] sm:$0xff]  }
   0x6   :  { %66 = vst [vmem:[#allocation2 + $0x58] sm:$0xff] %v34_v8   ;;  %v16_v11 = vld [vmem:[%s4271_s1 + $0x10] sm:$0xff]   ;;  %50 = vst [vmem:[#allocation2 + $0x18] sm:$0xff] %v18_v9   ;;  %v30_v12 = vld [vmem:[%s4271_s1 + $0x48] sm:$0xff]  }
   0x7   :  { %64 = vst [vmem:[#allocation2 + $0x50] sm:$0xff] %v32_v10   ;;  %48 = vst [vmem:[#allocation2 + $0x10] sm:$0xff] %v16_v11   ;;  %v14_v13 = vld [vmem:[%s4271_s1 + $0x8] sm:$0xff]   ;;  %v28_v14 = vld [vmem:[%s4271_s1 + $0x40] sm:$0xff]  }
   0x8   :  { %62 = vst [vmem:[#allocation2 + $0x48] sm:$0xff] %v30_v12   ;;  %46 = vst [vmem:[#allocation2 + $0x8] sm:$0xff] %v14_v13   ;;  %v12_v15 = vld [vmem:[%s4271_s1] sm:$0xff]   ;;  %v3624_v36 = vld [vmem:[%s4272_s0 + $0x14] ss:$8 sps:$4 sm:$0xff]  }
   0x9   :  { %60 = vst [vmem:[#allocation2 + $0x40] sm:$0xff] %v28_v14   ;;  %44 = vst [vmem:[#allocation2] sm:$0xff] %v12_v15   ;;  %v3602_v16 = vld [vmem:[%s4272_s0 + $0x4] ss:$8 sps:$4 sm:$0xff]   ;;  %v3392_v18 = vld [vmem:[#allocation2 + $0x78] sm:$0xff]  }
   0xa   :  { %v3607_v17 = vld [vmem:[%s4272_s0 + $0x84] ss:$8 sps:$4 sm:$0xff]   ;;  %460 = vmatprep.mubr.bf16.mxu0 %v3602_v16  ;;  %v3393_v19 = vld [vmem:[#allocation2 + $0x38] sm:$0xff]   ;;  %3040 = vmatprep.subr.bf16.mxu0 %v3392_v18  ;;  %v3394_v20 = vld [vmem:[#allocation2 + $0x70] sm:$0xff]  }
   0xb   :  { %524 = vmatprep.mubr.bf16.mxu1 %v3607_v17  ;;  %3376 = vmatprep.subr.bf16.mxu1 %v3392_v18  ;;  %v3395_v21 = vld [vmem:[#allocation2 + $0x30] sm:$0xff]   ;;  %v3396_v22 = vld [vmem:[#allocation2 + $0x68] sm:$0xff]  }
   0xc   :  { %3041 = vmatpush3.bf16.msra.mxu0 %v3393_v19  ;;  %3384 = vmatpush3.bf16.msra.mxu1 %v3393_v19  ;;  %v3397_v23 = vld [vmem:[#allocation2 + $0x28] sm:$0xff]   ;;  %v3398_v24 = vld [vmem:[#allocation2 + $0x60] sm:$0xff]   ;;  %v3629_v37 = vld [vmem:[%s4272_s0 + $0x94] ss:$8 sps:$4 sm:$0xff]  }
   0xd   :  { %3042 = vmatprep.subr.bf16.mxu0 %v3394_v20  ;;  %3377 = vmatprep.subr.bf16.mxu1 %v3394_v20  ;;  %v3399_v25 = vld [vmem:[#allocation2 + $0x20] sm:$0xff]   ;;  %v3400_v26 = vld [vmem:[#allocation2 + $0x58] sm:$0xff]  }
   0xe   :  { %v3401_v27 = vld [vmem:[#allocation2 + $0x18] sm:$0xff]   ;;  %v3402_v28 = vld [vmem:[#allocation2 + $0x50] sm:$0xff]   ;;  %v3614_v34 = vld [vmem:[%s4272_s0] ss:$8 sps:$4 sm:$0xff]  }
   0xf   :  { %v3403_v29 = vld [vmem:[#allocation2 + $0x10] sm:$0xff]   ;;  %v3404_v30 = vld [vmem:[#allocation2 + $0x48] sm:$0xff]  }
  0x10   :  { %3043 = vmatpush3.bf16.msra.mxu0 %v3395_v21  ;;  %3385 = vmatpush3.bf16.msra.mxu1 %v3395_v21  ;;  %v3405_v31 = vld [vmem:[#allocation2 + $0x8] sm:$0xff]   ;;  %v3406_v32 = vld [vmem:[#allocation2 + $0x40] sm:$0xff]   ;;  %v3638_v38 = vld [vmem:[%s4272_s0 + $0x10] ss:$8 sps:$4 sm:$0xff]  }
  0x11   :  { %3044 = vmatprep.subr.bf16.mxu0 %v3396_v22  ;;  %3378 = vmatprep.subr.bf16.mxu1 %v3396_v22  ;;  %v3407_v33 = vld [vmem:[#allocation2] sm:$0xff]   ;;  %v3643_v39 = vld [vmem:[%s4272_s0 + $0x90] ss:$8 sps:$4 sm:$0xff]   ;;  %v3672_v44 = vld [vmem:[%s4272_s0 + $0x34] ss:$8 sps:$4 sm:$0xff]  }
  0x12   :  { %v3619_v35 = vld [vmem:[%s4272_s0 + $0x80] ss:$8 sps:$4 sm:$0xff]   ;;  %v3648_v40 = vld [vmem:[%s4272_s0 + $0x24] ss:$8 sps:$4 sm:$0xff]   ;;  %v3677_v45 = vld [vmem:[%s4272_s0 + $0xb4] ss:$8 sps:$4 sm:$0xff]  }
  0x13   :  { %v3653_v41 = vld [vmem:[%s4272_s0 + $0xa4] ss:$8 sps:$4 sm:$0xff]   ;;  %v3662_v42 = vld [vmem:[%s4272_s0 + $0x20] ss:$8 sps:$4 sm:$0xff]   ;;  %v3686_v46 = vld [vmem:[%s4272_s0 + $0x30] ss:$8 sps:$4 sm:$0xff]  }
  0x14   :  { %3045 = vmatpush3.bf16.msra.mxu0 %v3397_v23  ;;  %3386 = vmatpush3.bf16.msra.mxu1 %v3397_v23  ;;  %v3667_v43 = vld [vmem:[%s4272_s0 + $0xa0] ss:$8 sps:$4 sm:$0xff]   ;;  %v3691_v47 = vld [vmem:[%s4272_s0 + $0xb0] ss:$8 sps:$4 sm:$0xff]   ;;  %v3696_v48 = vld [vmem:[%s4272_s0 + $0x44] ss:$8 sps:$4 sm:$0xff]  }
  0x15   :  { %3046 = vmatprep.subr.bf16.mxu0 %v3398_v24  ;;  %3379 = vmatprep.subr.bf16.mxu1 %v3398_v24  ;;  %v3701_v49 = vld [vmem:[%s4272_s0 + $0xc4] ss:$8 sps:$4 sm:$0xff]   ;;  %v3710_v50 = vld [vmem:[%s4272_s0 + $0x40] ss:$8 sps:$4 sm:$0xff]   ;;  %v3720_v52 = vld [vmem:[%s4272_s0 + $0x54] ss:$8 sps:$4 sm:$0xff]  }
  0x16   :  { %v3715_v51 = vld [vmem:[%s4272_s0 + $0xc0] ss:$8 sps:$4 sm:$0xff]   ;;  %v3725_v53 = vld [vmem:[%s4272_s0 + $0xd4] ss:$8 sps:$4 sm:$0xff]   ;;  %v3734_v54 = vld [vmem:[%s4272_s0 + $0x50] ss:$8 sps:$4 sm:$0xff]  }
  0x17   :  { %v3739_v55 = vld [vmem:[%s4272_s0 + $0xd0] ss:$8 sps:$4 sm:$0xff]   ;;  %v3744_v56 = vld [vmem:[%s4272_s0 + $0x64] ss:$8 sps:$4 sm:$0xff]   ;;  %v3758_v58 = vld [vmem:[%s4272_s0 + $0x60] ss:$8 sps:$4 sm:$0xff]  }
  0x18   :  { %3047 = vmatpush3.bf16.msra.mxu0 %v3399_v25  ;;  %3387 = vmatpush3.bf16.msra.mxu1 %v3399_v25  ;;  %v3749_v57 = vld [vmem:[%s4272_s0 + $0xe4] ss:$8 sps:$4 sm:$0xff]   ;;  %v3763_v59 = vld [vmem:[%s4272_s0 + $0xe0] ss:$8 sps:$4 sm:$0xff]   ;;  %v3768_v60 = vld [vmem:[%s4272_s0 + $0x74] ss:$8 sps:$4 sm:$0xff]  }
  0x19   :  { %3048 = vmatprep.subr.bf16.mxu0 %v3400_v26  ;;  %3380 = vmatprep.subr.bf16.mxu1 %v3400_v26  ;;  %v3773_v61 = vld [vmem:[%s4272_s0 + $0xf4] ss:$8 sps:$4 sm:$0xff]   ;;  %v3782_v62 = vld [vmem:[%s4272_s0 + $0x70] ss:$8 sps:$4 sm:$0xff]  }
  0x1a   :  { %v3787_v63 = vld [vmem:[%s4272_s0 + $0xf0] ss:$8 sps:$4 sm:$0xff]  }
  0x1c   :  { %3049 = vmatpush3.bf16.msra.mxu0 %v3401_v27  ;;  %3388 = vmatpush3.bf16.msra.mxu1 %v3401_v27 }
  0x1d   :  { %3050 = vmatprep.subr.bf16.mxu0 %v3402_v28  ;;  %3381 = vmatprep.subr.bf16.mxu1 %v3402_v28 }
  0x20   :  { %3051 = vmatpush3.bf16.msra.mxu0 %v3403_v29  ;;  %3389 = vmatpush3.bf16.msra.mxu1 %v3403_v29 }
  0x21   :  { %3052 = vmatprep.subr.bf16.mxu0 %v3404_v30  ;;  %3382 = vmatprep.subr.bf16.mxu1 %v3404_v30 }
  0x24   :  { %3053 = vmatpush3.bf16.msra.mxu0 %v3405_v31  ;;  %3390 = vmatpush3.bf16.msra.mxu1 %v3405_v31 }
  0x25   :  { %3054 = vmatprep.subr.bf16.mxu0 %v3406_v32  ;;  %3383 = vmatprep.subr.bf16.mxu1 %v3406_v32 }
  0x28   :  { %3055 = vmatpush3.bf16.msra.mxu0 %v3407_v33  ;;  %3391 = vmatpush3.bf16.msra.mxu1 %v3407_v33 }
  0x2b   :  { %461 = vmatmul.mubr.bf16.vlgmr.msra.gmra.mxu0 %v3614_v34  ;;  %525 = vmatmul.mubr.bf16.vlgmr.msra.gmra.mxu1 %v3619_v35 }
  0x2c   :  { %468 = vmatprep.mubr.bf16.mxu0 %v3624_v36  ;;  %532 = vmatprep.mubr.bf16.mxu1 %v3629_v37 }
  0x33   :  { %469 = vmatmul.mubr.bf16.gmra.mxu0 %v3638_v38  ;;  %533 = vmatmul.mubr.bf16.gmra.mxu1 %v3643_v39 }
  0x34   :  { %476 = vmatprep.mubr.bf16.mxu0 %v3648_v40  ;;  %540 = vmatprep.mubr.bf16.mxu1 %v3653_v41 }
  0x3b   :  { %477 = vmatmul.mubr.bf16.gmra.mxu0 %v3662_v42  ;;  %541 = vmatmul.mubr.bf16.gmra.mxu1 %v3667_v43 }
  0x3c   :  { %484 = vmatprep.mubr.bf16.mxu0 %v3672_v44  ;;  %548 = vmatprep.mubr.bf16.mxu1 %v3677_v45 }
  0x43   :  { %485 = vmatmul.mubr.bf16.gmra.mxu0 %v3686_v46  ;;  %549 = vmatmul.mubr.bf16.gmra.mxu1 %v3691_v47 }
  0x44   :  { %492 = vmatprep.mubr.bf16.mxu0 %v3696_v48  ;;  %556 = vmatprep.mubr.bf16.mxu1 %v3701_v49 }
  0x4b   :  { %493 = vmatmul.mubr.bf16.gmra.mxu0 %v3710_v50  ;;  %557 = vmatmul.mubr.bf16.gmra.mxu1 %v3715_v51 }
  0x4c   :  { %500 = vmatprep.mubr.bf16.mxu0 %v3720_v52  ;;  %564 = vmatprep.mubr.bf16.mxu1 %v3725_v53 }
  0x53   :  { %501 = vmatmul.mubr.bf16.gmra.mxu0 %v3734_v54  ;;  %565 = vmatmul.mubr.bf16.gmra.mxu1 %v3739_v55 }
  0x54   :  { %508 = vmatprep.mubr.bf16.mxu0 %v3744_v56  ;;  %572 = vmatprep.mubr.bf16.mxu1 %v3749_v57 }
  0x5b   :  { %509 = vmatmul.mubr.bf16.gmra.mxu0 %v3758_v58  ;;  %573 = vmatmul.mubr.bf16.gmra.mxu1 %v3763_v59 }
  0x5c   :  { %516 = vmatprep.mubr.bf16.mxu0 %v3768_v60  ;;  %580 = vmatprep.mubr.bf16.mxu1 %v3773_v61 }
  0x63   :  { %517 = vmatmul.mubr.bf16.gmra.mxu0 %v3782_v62  ;;  %581 = vmatmul.mubr.bf16.gmra.mxu1 %v3787_v63 }
  0x64   :  { %1197 = vmatprep.mubr.bf16.mxu1 %v3602_v16 }
  0xeb   :  { %v3056_v0 = vpop.f32.mrf.mxu0  ;;  %v3104_v1 = vpop.f32.mrf.mxu1 }
  0xed   :  { %v3057_v2 = vpop.f32.mrf.mxu0  ;;  %v3105_v3 = vpop.f32.mrf.mxu1 }
  0xee   :  { %v3792_v8 = vadd.f32 %v3057_v2, %v3056_v0  ;;  %v3794_v9 = vadd.f32 %v3105_v3, %v3104_v1 }
  0xef   :  { %v3059_v4 = vpop.f32.mrf.mxu0  ;;  %v3107_v5 = vpop.f32.mrf.mxu1 }
  0xf1   :  { %v3060_v6 = vpop.f32.mrf.mxu0  ;;  %v3108_v7 = vpop.f32.mrf.mxu1 }
  0xf2   :  { %v3796_v10 = vadd.f32 %v3060_v6, %v3059_v4  ;;  %v3798_v11 = vadd.f32 %v3108_v7, %v3107_v5 }
  0xf3   :  { %v3062_v12 = vpop.f32.mrf.mxu0  ;;  %v3110_v13 = vpop.f32.mrf.mxu1 }
  0xf4   :  { %v2758_v14 = vpack.c.bf16 %v3796_v10, %v3792_v8  ;;  %v2798_v15 = vpack.c.bf16 %v3798_v11, %v3794_v9 }
  0xf5   :  { %v3063_v16 = vpop.f32.mrf.mxu0  ;;  %v3111_v18 = vpop.f32.mrf.mxu1 }
  0xf6   :  { %2759 = vst [vmem:[#allocation2] sm:$0xff] %v2758_v14   ;;  %3002 = vst [vmem:[#allocation2 + $0x40] sm:$0xff] %v2798_v15   ;;  %v3804_v23 = vadd.f32 %v3063_v16, %v3062_v12  ;;  %v3806_v24 = vadd.f32 %v3111_v18, %v3110_v13 }
  0xf7   :  { %v3065_v19 = vpop.f32.mrf.mxu0  ;;  %v3113_v20 = vpop.f32.mrf.mxu1 }
  0xf8   :  { %4288 = vst [vmem:[#allocation4_spill] sm:$0xff] %v3806_v24 }
  0xf9   :  { %v3066_v21 = vpop.f32.mrf.mxu0  ;;  %v3114_v22 = vpop.f32.mrf.mxu1 }
  0xfa   :  { %v3808_v25 = vadd.f32 %v3066_v21, %v3065_v19  ;;  %v3810_v26 = vadd.f32 %v3114_v22, %v3113_v20 }
  0xfb   :  { %v3068_v27 = vpop.f32.mrf.mxu0  ;;  %v3116_v28 = vpop.f32.mrf.mxu1 }
  0xfc   :  { %4289 = vst [vmem:[#allocation5_spill] sm:$0xff] %v3810_v26  ;;  %v2763_v29 = vpack.c.bf16 %v3808_v25, %v3804_v23  ;;  %v2803_v30 = vpack.c.bf16 %v3810_v26, %v3806_v24 }
  0xfd   :  { %v3069_v31 = vpop.f32.mrf.mxu0  ;;  %v3117_v32 = vpop.f32.mrf.mxu1 }
  0xfe   :  { %2995 = vst [vmem:[#allocation2 + $0x8] sm:$0xff] %v2763_v29   ;;  %3003 = vst [vmem:[#allocation2 + $0x48] sm:$0xff] %v2803_v30   ;;  %v3816_v3 = vadd.f32 %v3069_v31, %v3068_v27  ;;  %v3818_v4 = vadd.f32 %v3117_v32, %v3116_v28 }
  0xff   :  { %v3071_v33 = vpop.f32.mrf.mxu0  ;;  %v3119_v0 = vpop.f32.mrf.mxu1 }
 0x100   :  { %4290 = vst [vmem:[#allocation6_spill] sm:$0xff] %v3818_v4 }
 0x101   :  { %v3072_v1 = vpop.f32.mrf.mxu0  ;;  %v3120_v2 = vpop.f32.mrf.mxu1 }
 0x102   :  { %v3820_v5 = vadd.f32 %v3072_v1, %v3071_v33  ;;  %v3822_v6 = vadd.f32 %v3120_v2, %v3119_v0 }
 0x103   :  { %v3074_v7 = vpop.f32.mrf.mxu0  ;;  %v3122_v12 = vpop.f32.mrf.mxu1 }
 0x104   :  { %4291 = vst [vmem:[#allocation7_spill] sm:$0xff] %v3822_v6  ;;  %v2768_v13 = vpack.c.bf16 %v3820_v5, %v3816_v3  ;;  %v2808_v14 = vpack.c.bf16 %v3822_v6, %v3818_v4 }
 0x105   :  { %v3075_v15 = vpop.f32.mrf.mxu0  ;;  %v3123_v16 = vpop.f32.mrf.mxu1 }
 0x106   :  { %2996 = vst [vmem:[#allocation2 + $0x10] sm:$0xff] %v2768_v13   ;;  %3004 = vst [vmem:[#allocation2 + $0x50] sm:$0xff] %v2808_v14   ;;  %v3828_v22 = vadd.f32 %v3075_v15, %v3074_v7  ;;  %v3830_v27 = vadd.f32 %v3123_v16, %v3122_v12 }
 0x107   :  { %v3077_v18 = vpop.f32.mrf.mxu0  ;;  %v3125_v19 = vpop.f32.mrf.mxu1 }
 0x108   :  { %4292 = vst [vmem:[#allocation8_spill] sm:$0xff] %v3830_v27 }
 0x109   :  { %v3078_v20 = vpop.f32.mrf.mxu0  ;;  %v3126_v21 = vpop.f32.mrf.mxu1 }
 0x10a   :  { %v3832_v28 = vadd.f32 %v3078_v20, %v3077_v18  ;;  %v3834_v29 = vadd.f32 %v3126_v21, %v3125_v19 }
 0x10b   :  { %v3080_v30 = vpop.f32.mrf.mxu0  ;;  %v3128_v31 = vpop.f32.mrf.mxu1 }
 0x10c   :  { %4293 = vst [vmem:[#allocation9_spill] sm:$0xff] %v3834_v29  ;;  %v2773_v32 = vpack.c.bf16 %v3832_v28, %v3828_v22  ;;  %v2813_v33 = vpack.c.bf16 %v3834_v29, %v3830_v27 }
 0x10d   :  { %v3081_v0 = vpop.f32.mrf.mxu0  ;;  %v3129_v1 = vpop.f32.mrf.mxu1 }
 0x10e   :  { %2997 = vst [vmem:[#allocation2 + $0x18] sm:$0xff] %v2773_v32   ;;  %3005 = vst [vmem:[#allocation2 + $0x58] sm:$0xff] %v2813_v33   ;;  %v3840_v14 = vadd.f32 %v3081_v0, %v3080_v30  ;;  %v3842_v15 = vadd.f32 %v3129_v1, %v3128_v31 }
 0x10f   :  { %v3083_v2 = vpop.f32.mrf.mxu0  ;;  %v3131_v7 = vpop.f32.mrf.mxu1 }
 0x110   :  { %4294 = vst [vmem:[#allocation10_spill] sm:$0xff] %v3842_v15 }
 0x111   :  { %v3084_v12 = vpop.f32.mrf.mxu0  ;;  %v3132_v13 = vpop.f32.mrf.mxu1 }
 0x112   :  { %v3844_v16 = vadd.f32 %v3084_v12, %v3083_v2  ;;  %v3846_v18 = vadd.f32 %v3132_v13, %v3131_v7 }
 0x113   :  { %v3086_v19 = vpop.f32.mrf.mxu0  ;;  %v3134_v20 = vpop.f32.mrf.mxu1 }
 0x114   :  { %4295 = vst [vmem:[#allocation11_spill] sm:$0xff] %v3846_v18  ;;  %v2778_v21 = vpack.c.bf16 %v3844_v16, %v3840_v14  ;;  %v2818_v32 = vpack.c.bf16 %v3846_v18, %v3842_v15 }
 0x115   :  { %v3087_v33 = vpop.f32.mrf.mxu0  ;;  %v3135_v29 = vpop.f32.mrf.mxu1 }
 0x116   :  { %2998 = vst [vmem:[#allocation2 + $0x20] sm:$0xff] %v2778_v21   ;;  %3006 = vst [vmem:[#allocation2 + $0x60] sm:$0xff] %v2818_v32   ;;  %v3852_v2 = vadd.f32 %v3087_v33, %v3086_v19  ;;  %v3854_v7 = vadd.f32 %v3135_v29, %v3134_v20 }
 0x117   :  { %v3089_v30 = vpop.f32.mrf.mxu0  ;;  %v3137_v0 = vpop.f32.mrf.mxu1 }
 0x118   :  { %4296 = vst [vmem:[#allocation12_spill] sm:$0xff] %v3854_v7 }
 0x119   :  { %v3090_v31 = vpop.f32.mrf.mxu0  ;;  %v3138_v1 = vpop.f32.mrf.mxu1 }
 0x11a   :  { %v3856_v12 = vadd.f32 %v3090_v31, %v3089_v30  ;;  %v3858_v13 = vadd.f32 %v3138_v1, %v3137_v0 }
 0x11b   :  { %v3092_v27 = vpop.f32.mrf.mxu0  ;;  %v3140_v6 = vpop.f32.mrf.mxu1 }
 0x11c   :  { %4297 = vst [vmem:[#allocation13_spill] sm:$0xff] %v3858_v13  ;;  %v2783_v18 = vpack.c.bf16 %v3856_v12, %v3852_v2  ;;  %v2823_v21 = vpack.c.bf16 %v3858_v13, %v3854_v7 }
 0x11d   :  { %v3093_v32 = vpop.f32.mrf.mxu0  ;;  %v3141_v15 = vpop.f32.mrf.mxu1 }
 0x11e   :  { %2999 = vst [vmem:[#allocation2 + $0x28] sm:$0xff] %v2783_v18   ;;  %3007 = vst [vmem:[#allocation2 + $0x68] sm:$0xff] %v2823_v21   ;;  %v3864_v30 = vadd.f32 %v3093_v32, %v3092_v27  ;;  %v3866_v0 = vadd.f32 %v3141_v15, %v3140_v6 }
 0x11f   :  { %v3095_v19 = vpop.f32.mrf.mxu0  ;;  %v3143_v33 = vpop.f32.mrf.mxu1 }
 0x120   :  { %4298 = vst [vmem:[#allocation14_spill] sm:$0xff] %v3866_v0 }
 0x121   :  { %v3096_v29 = vpop.f32.mrf.mxu0  ;;  %v3144_v20 = vpop.f32.mrf.mxu1 }
 0x122   :  { %v3868_v31 = vadd.f32 %v3096_v29, %v3095_v19  ;;  %v3870_v1 = vadd.f32 %v3144_v20, %v3143_v33 }
 0x123   :  { %v3098_v4 = vpop.f32.mrf.mxu0  ;;  %v3146_v26 = vpop.f32.mrf.mxu1 }
 0x124   :  { %4299 = vst [vmem:[#allocation15_spill] sm:$0xff] %v3870_v1  ;;  %v2788_v13 = vpack.c.bf16 %v3868_v31, %v3864_v30  ;;  %v2828_v18 = vpack.c.bf16 %v3870_v1, %v3866_v0 }
 0x125   :  { %v3099_v21 = vpop.f32.mrf.mxu0  ;;  %v3147_v7 = vpop.f32.mrf.mxu1 }
 0x126   :  { %3000 = vst [vmem:[#allocation2 + $0x30] sm:$0xff] %v2788_v13   ;;  %3008 = vst [vmem:[#allocation2 + $0x70] sm:$0xff] %v2828_v18   ;;  %v3876_v19 = vadd.f32 %v3099_v21, %v3098_v4  ;;  %v3878_v33 = vadd.f32 %v3147_v7, %v3146_v26  ;;  %v3460_v4 = vld [vmem:[#allocation2 + $0x68] sm:$0xff]   ;;  %v3462_v21 = vld [vmem:[#allocation2 + $0x60] sm:$0xff]  }
 0x127   :  { %v3101_v27 = vpop.f32.mrf.mxu0  ;;  %v3149_v32 = vpop.f32.mrf.mxu1  ;;  %v3461_v7 = vld [vmem:[#allocation2 + $0x28] sm:$0xff]  }
 0x129   :  { %v3102_v6 = vpop.f32.mrf.mxu0  ;;  %v3150_v15 = vpop.f32.mrf.mxu1 }
 0x12a   :  { %v3880_v29 = vadd.f32 %v3102_v6, %v3101_v27  ;;  %v3882_v20 = vadd.f32 %v3150_v15, %v3149_v32  ;;  %v3463_v27 = vld [vmem:[#allocation2 + $0x20] sm:$0xff]   ;;  %v3464_v32 = vld [vmem:[#allocation2 + $0x58] sm:$0xff]   ;;  %v3467_v6 = vld [vmem:[#allocation2 + $0x10] sm:$0xff]  }
 0x12b   :  { %v3468_v15 = vld [vmem:[#allocation2 + $0x48] sm:$0xff]  }
 0x12c   :  { %4300 = vst [vmem:[#allocation16_spill] sm:$0xff] %v3882_v20  ;;  %v2793_v24 = vpack.c.bf16 %v3880_v29, %v3876_v19  ;;  %v2833_v1 = vpack.c.bf16 %v3882_v20, %v3878_v33 }
 0x12d   :  { %v3458_v0 = vld [vmem:[#allocation2 + $0x70] sm:$0xff]  }
 0x12e   :  { %3001 = vst [vmem:[#allocation2 + $0x38] sm:$0xff] %v2793_v24   ;;  %3009 = vst [vmem:[#allocation2 + $0x78] sm:$0xff] %v2833_v1   ;;  %v3459_v26 = vld [vmem:[#allocation2 + $0x30] sm:$0xff]   ;;  %v3465_v24 = vld [vmem:[#allocation2 + $0x18] sm:$0xff]  }
 0x12f   :  { %v3466_v1 = vld [vmem:[#allocation2 + $0x50] sm:$0xff]  }
 0x135   :  { %v3456_v13 = vld [vmem:[#allocation2 + $0x78] sm:$0xff]  }
 0x136   :  { %v3457_v18 = vld [vmem:[#allocation2 + $0x38] sm:$0xff]   ;;  %3152 = vmatprep.subr.bf16.mxu1 %v3456_v13  ;;  %v3470_v13 = vld [vmem:[#allocation2 + $0x40] sm:$0xff]  }
 0x137   :  { %3153 = vmatpush3.bf16.msra.mxu1 %v3457_v18  ;;  %v3471_v18 = vld [vmem:[#allocation2] sm:$0xff]  }
 0x138   :  { %3154 = vmatprep.subr.bf16.mxu1 %v3458_v0  ;;  %v3469_v0 = vld [vmem:[#allocation2 + $0x8] sm:$0xff]  }
 0x13b   :  { %3155 = vmatpush3.bf16.msra.mxu1 %v3459_v26 }
 0x13c   :  { %3156 = vmatprep.subr.bf16.mxu1 %v3460_v4 }
 0x13f   :  { %3157 = vmatpush3.bf16.msra.mxu1 %v3461_v7 }
 0x140   :  { %3158 = vmatprep.subr.bf16.mxu1 %v3462_v21 }
 0x143   :  { %3159 = vmatpush3.bf16.msra.mxu1 %v3463_v27 }
 0x144   :  { %3160 = vmatprep.subr.bf16.mxu1 %v3464_v32  ;;  %v3490_v32 = vld [vmem:[%s4272_s0 + $0x4] ss:$8 sps:$4 sm:$0xff]  }
 0x145   :  { %1934 = vmatprep.mubr.bf16.mxu0 %v3490_v32 }
 0x147   :  { %3161 = vmatpush3.bf16.msra.mxu1 %v3465_v24 }
 0x148   :  { %3162 = vmatprep.subr.bf16.mxu1 %v3466_v1 }
 0x14b   :  { %3163 = vmatpush3.bf16.msra.mxu1 %v3467_v6 }
 0x14c   :  { %3164 = vmatprep.subr.bf16.mxu1 %v3468_v15 }
 0x14f   :  { %3165 = vmatpush3.bf16.msra.mxu1 %v3469_v0 }
 0x150   :  { %3166 = vmatprep.subr.bf16.mxu1 %v3470_v13 }
 0x153   :  { %3167 = vmatpush3.bf16.msra.mxu1 %v3471_v18 }
 0x156   :  { %1198 = vmatmul.mubr.bf16.vlgmr.msra.gmra.mxu1 %v3614_v34 }
 0x157   :  { %1205 = vmatprep.mubr.bf16.mxu1 %v3624_v36 }
 0x15e   :  { %1206 = vmatmul.mubr.bf16.gmra.mxu1 %v3638_v38 }
 0x15f   :  { %1213 = vmatprep.mubr.bf16.mxu1 %v3648_v40 }
 0x166   :  { %1214 = vmatmul.mubr.bf16.gmra.mxu1 %v3662_v42 }
 0x167   :  { %1221 = vmatprep.mubr.bf16.mxu1 %v3672_v44 }
 0x16e   :  { %1222 = vmatmul.mubr.bf16.gmra.mxu1 %v3686_v46 }
 0x16f   :  { %1229 = vmatprep.mubr.bf16.mxu1 %v3696_v48 }
 0x176   :  { %1230 = vmatmul.mubr.bf16.gmra.mxu1 %v3710_v50 }
 0x177   :  { %1237 = vmatprep.mubr.bf16.mxu1 %v3720_v52 }
 0x17e   :  { %1238 = vmatmul.mubr.bf16.gmra.mxu1 %v3734_v54 }
 0x17f   :  { %1245 = vmatprep.mubr.bf16.mxu1 %v3744_v56 }
 0x186   :  { %1246 = vmatmul.mubr.bf16.gmra.mxu1 %v3758_v58 }
 0x187   :  { %1253 = vmatprep.mubr.bf16.mxu1 %v3768_v60 }
 0x18e   :  { %1254 = vmatmul.mubr.bf16.gmra.mxu1 %v3782_v62 }
 0x18f   :  { %1261 = vmatprep.mubr.bf16.mxu1 %v3607_v17 }
 0x196   :  { %1262 = vmatmul.mubr.bf16.gmra.mxu1 %v3619_v35 }
 0x197   :  { %1269 = vmatprep.mubr.bf16.mxu1 %v3629_v37 }
 0x19e   :  { %1270 = vmatmul.mubr.bf16.gmra.mxu1 %v3643_v39 }
 0x19f   :  { %1277 = vmatprep.mubr.bf16.mxu1 %v3653_v41 }
 0x1a6   :  { %1278 = vmatmul.mubr.bf16.gmra.mxu1 %v3667_v43 }
 0x1a7   :  { %1285 = vmatprep.mubr.bf16.mxu1 %v3677_v45 }
 0x1ae   :  { %1286 = vmatmul.mubr.bf16.gmra.mxu1 %v3691_v47 }
 0x1af   :  { %1293 = vmatprep.mubr.bf16.mxu1 %v3701_v49 }
 0x1b6   :  { %1294 = vmatmul.mubr.bf16.gmra.mxu1 %v3715_v51 }
 0x1b7   :  { %1301 = vmatprep.mubr.bf16.mxu1 %v3725_v53 }
 0x1be   :  { %1302 = vmatmul.mubr.bf16.gmra.mxu1 %v3739_v55 }
 0x1bf   :  { %1309 = vmatprep.mubr.bf16.mxu1 %v3749_v57 }
 0x1c6   :  { %1310 = vmatmul.mubr.bf16.gmra.mxu1 %v3763_v59 }
 0x1c7   :  { %1317 = vmatprep.mubr.bf16.mxu1 %v3773_v61 }
 0x1ce   :  { %1318 = vmatmul.mubr.bf16.gmra.mxu1 %v3787_v63 }
 0x216   :  { %v3168_v17 = vpop.f32.mrf.mxu1 }
 0x218   :  { %v3169_v34 = vpop.f32.mrf.mxu1 }
 0x219   :  { %v3919_v37 = vadd.f32 %v3169_v34, %v3168_v17 }
 0x21a   :  { %v3171_v35 = vpop.f32.mrf.mxu1 }
 0x21c   :  { %v3172_v36 = vpop.f32.mrf.mxu1 }
 0x21d   :  { %v3921_v38 = vadd.f32 %v3172_v36, %v3171_v35 }
 0x21e   :  { %v3174_v39 = vpop.f32.mrf.mxu1 }
 0x21f   :  { %v2838_v40 = vpack.c.bf16 %v3921_v38, %v3919_v37 }
 0x220   :  { %v3175_v41 = vpop.f32.mrf.mxu1 }
 0x221   :  { %2839 = vst [vmem:[#allocation2] sm:$0xff] %v2838_v40   ;;  %v3925_v44 = vadd.f32 %v3175_v41, %v3174_v39 }
 0x222   :  { %v3177_v42 = vpop.f32.mrf.mxu1 }
 0x224   :  { %v3178_v43 = vpop.f32.mrf.mxu1 }
 0x225   :  { %v3927_v45 = vadd.f32 %v3178_v43, %v3177_v42 }
 0x226   :  { %v3180_v46 = vpop.f32.mrf.mxu1 }
 0x227   :  { %v2843_v47 = vpack.c.bf16 %v3927_v45, %v3925_v44 }
 0x228   :  { %v3181_v48 = vpop.f32.mrf.mxu1 }
 0x229   :  { %3010 = vst [vmem:[#allocation2 + $0x8] sm:$0xff] %v2843_v47   ;;  %v3931_v51 = vadd.f32 %v3181_v48, %v3180_v46 }
 0x22a   :  { %v3183_v49 = vpop.f32.mrf.mxu1 }
 0x22c   :  { %v3184_v50 = vpop.f32.mrf.mxu1 }
 0x22d   :  { %v3933_v52 = vadd.f32 %v3184_v50, %v3183_v49 }
 0x22e   :  { %v3186_v53 = vpop.f32.mrf.mxu1 }
 0x22f   :  { %v2848_v54 = vpack.c.bf16 %v3933_v52, %v3931_v51 }
 0x230   :  { %v3187_v55 = vpop.f32.mrf.mxu1 }
 0x231   :  { %3011 = vst [vmem:[#allocation2 + $0x10] sm:$0xff] %v2848_v54   ;;  %v3937_v58 = vadd.f32 %v3187_v55, %v3186_v53 }
 0x232   :  { %v3189_v56 = vpop.f32.mrf.mxu1 }
 0x234   :  { %v3190_v57 = vpop.f32.mrf.mxu1 }
 0x235   :  { %v3939_v59 = vadd.f32 %v3190_v57, %v3189_v56 }
 0x236   :  { %v3192_v60 = vpop.f32.mrf.mxu1 }
 0x237   :  { %v2853_v61 = vpack.c.bf16 %v3939_v59, %v3937_v58 }
 0x238   :  { %v3193_v62 = vpop.f32.mrf.mxu1 }
 0x239   :  { %3012 = vst [vmem:[#allocation2 + $0x18] sm:$0xff] %v2853_v61   ;;  %v3943_v4 = vadd.f32 %v3193_v62, %v3192_v60 }
 0x23a   :  { %v3195_v63 = vpop.f32.mrf.mxu1 }
 0x23c   :  { %v3196_v26 = vpop.f32.mrf.mxu1 }
 0x23d   :  { %v3945_v7 = vadd.f32 %v3196_v26, %v3195_v63 }
 0x23e   :  { %v3198_v21 = vpop.f32.mrf.mxu1 }
 0x23f   :  { %v2858_v27 = vpack.c.bf16 %v3945_v7, %v3943_v4 }
 0x240   :  { %v3199_v24 = vpop.f32.mrf.mxu1 }
 0x241   :  { %3013 = vst [vmem:[#allocation2 + $0x20] sm:$0xff] %v2858_v27   ;;  %v3952_v15 = vadd.f32 %v3199_v24, %v3198_v21 }
 0x242   :  { %v3201_v1 = vpop.f32.mrf.mxu1 }
 0x244   :  { %v3202_v6 = vpop.f32.mrf.mxu1 }
 0x245   :  { %v3954_v0 = vadd.f32 %v3202_v6, %v3201_v1 }
 0x246   :  { %v3204_v13 = vpop.f32.mrf.mxu1 }
 0x247   :  { %v2863_v18 = vpack.c.bf16 %v3954_v0, %v3952_v15 }
 0x248   :  { %v3205_v17 = vpop.f32.mrf.mxu1 }
 0x249   :  { %3014 = vst [vmem:[#allocation2 + $0x28] sm:$0xff] %v2863_v18   ;;  %v3958_v36 = vadd.f32 %v3205_v17, %v3204_v13 }
 0x24a   :  { %v3207_v34 = vpop.f32.mrf.mxu1 }
 0x24c   :  { %v3208_v35 = vpop.f32.mrf.mxu1 }
 0x24d   :  { %v3960_v39 = vadd.f32 %v3208_v35, %v3207_v34 }
 0x24e   :  { %v3210_v40 = vpop.f32.mrf.mxu1 }
 0x24f   :  { %v2868_v41 = vpack.c.bf16 %v3960_v39, %v3958_v36 }
 0x250   :  { %v3211_v42 = vpop.f32.mrf.mxu1 }
 0x251   :  { %3015 = vst [vmem:[#allocation2 + $0x30] sm:$0xff] %v2868_v41   ;;  %v3964_v47 = vadd.f32 %v3211_v42, %v3210_v40 }
 0x252   :  { %v3213_v43 = vpop.f32.mrf.mxu1 }
 0x254   :  { %v3214_v46 = vpop.f32.mrf.mxu1 }
 0x255   :  { %v3966_v48 = vadd.f32 %v3214_v46, %v3213_v43 }
 0x256   :  { %v3216_v49 = vpop.f32.mrf.mxu1 }
 0x257   :  { %v2873_v50 = vpack.c.bf16 %v3966_v48, %v3964_v47 }
 0x258   :  { %v3217_v53 = vpop.f32.mrf.mxu1 }
 0x259   :  { %3016 = vst [vmem:[#allocation2 + $0x38] sm:$0xff] %v2873_v50   ;;  %v3970_v56 = vadd.f32 %v3217_v53, %v3216_v49 }
 0x25a   :  { %v3219_v54 = vpop.f32.mrf.mxu1 }
 0x25c   :  { %v3220_v55 = vpop.f32.mrf.mxu1 }
 0x25d   :  { %v3972_v57 = vadd.f32 %v3220_v55, %v3219_v54 }
 0x25e   :  { %v3222_v60 = vpop.f32.mrf.mxu1 }
 0x25f   :  { %v2878_v61 = vpack.c.bf16 %v3972_v57, %v3970_v56 }
 0x260   :  { %v3223_v62 = vpop.f32.mrf.mxu1 }
 0x261   :  { %3017 = vst [vmem:[#allocation2 + $0x40] sm:$0xff] %v2878_v61   ;;  %v3976_v21 = vadd.f32 %v3223_v62, %v3222_v60 }
 0x262   :  { %v3225_v63 = vpop.f32.mrf.mxu1 }
 0x264   :  { %v3226_v26 = vpop.f32.mrf.mxu1 }
 0x265   :  { %v3978_v27 = vadd.f32 %v3226_v26, %v3225_v63 }
 0x266   :  { %v3228_v32 = vpop.f32.mrf.mxu1 }
 0x267   :  { %v2883_v24 = vpack.c.bf16 %v3978_v27, %v3976_v21 }
 0x268   :  { %v3229_v1 = vpop.f32.mrf.mxu1 }
 0x269   :  { %3018 = vst [vmem:[#allocation2 + $0x48] sm:$0xff] %v2883_v24   ;;  %v3982_v18 = vadd.f32 %v3229_v1, %v3228_v32 }
 0x26a   :  { %v3231_v6 = vpop.f32.mrf.mxu1 }
 0x26c   :  { %v3232_v13 = vpop.f32.mrf.mxu1 }
 0x26d   :  { %v3984_v17 = vadd.f32 %v3232_v13, %v3231_v6 }
 0x26e   :  { %v3234_v34 = vpop.f32.mrf.mxu1 }
 0x26f   :  { %v2888_v35 = vpack.c.bf16 %v3984_v17, %v3982_v18 }
 0x270   :  { %v3235_v40 = vpop.f32.mrf.mxu1 }
 0x271   :  { %3019 = vst [vmem:[#allocation2 + $0x50] sm:$0xff] %v2888_v35   ;;  %v3988_v43 = vadd.f32 %v3235_v40, %v3234_v34 }
 0x272   :  { %v3237_v41 = vpop.f32.mrf.mxu1 }
 0x274   :  { %v3238_v42 = vpop.f32.mrf.mxu1 }
 0x275   :  { %v3990_v46 = vadd.f32 %v3238_v42, %v3237_v41 }
 0x276   :  { %v3240_v49 = vpop.f32.mrf.mxu1 }
 0x277   :  { %v2893_v50 = vpack.c.bf16 %v3990_v46, %v3988_v43 }
 0x278   :  { %v3241_v53 = vpop.f32.mrf.mxu1 }
 0x279   :  { %3020 = vst [vmem:[#allocation2 + $0x58] sm:$0xff] %v2893_v50   ;;  %v3994_v60 = vadd.f32 %v3241_v53, %v3240_v49 }
 0x27a   :  { %v3243_v54 = vpop.f32.mrf.mxu1 }
 0x27c   :  { %v3244_v55 = vpop.f32.mrf.mxu1 }
 0x27d   :  { %v3996_v61 = vadd.f32 %v3244_v55, %v3243_v54 }
 0x27e   :  { %v3246_v62 = vpop.f32.mrf.mxu1 }
 0x27f   :  { %v2898_v63 = vpack.c.bf16 %v3996_v61, %v3994_v60 }
 0x280   :  { %v3247_v26 = vpop.f32.mrf.mxu1 }
 0x281   :  { %3021 = vst [vmem:[#allocation2 + $0x60] sm:$0xff] %v2898_v63   ;;  %v4000_v1 = vadd.f32 %v3247_v26, %v3246_v62 }
 0x282   :  { %v3249_v32 = vpop.f32.mrf.mxu1 }
 0x284   :  { %v3250_v24 = vpop.f32.mrf.mxu1 }
 0x285   :  { %v4002_v6 = vadd.f32 %v3250_v24, %v3249_v32 }
 0x286   :  { %v3252_v13 = vpop.f32.mrf.mxu1 }
 0x287   :  { %v2903_v34 = vpack.c.bf16 %v4002_v6, %v4000_v1 }
 0x288   :  { %v3253_v35 = vpop.f32.mrf.mxu1 }
 0x289   :  { %3022 = vst [vmem:[#allocation2 + $0x68] sm:$0xff] %v2903_v34   ;;  %v4006_v42 = vadd.f32 %v3253_v35, %v3252_v13  ;;  %v3473_v13 = vld [vmem:[#allocation2 + $0x38] sm:$0xff]   ;;  %v3475_v35 = vld [vmem:[#allocation2 + $0x30] sm:$0xff]  }
 0x28a   :  { %v3255_v40 = vpop.f32.mrf.mxu1 }
 0x28c   :  { %v3256_v41 = vpop.f32.mrf.mxu1 }
 0x28d   :  { %v4008_v49 = vadd.f32 %v3256_v41, %v3255_v40  ;;  %v3477_v41 = vld [vmem:[#allocation2 + $0x28] sm:$0xff]  }
 0x28e   :  { %v3258_v50 = vpop.f32.mrf.mxu1 }
 0x28f   :  { %v2908_v53 = vpack.c.bf16 %v4008_v49, %v4006_v42 }
 0x290   :  { %v3259_v54 = vpop.f32.mrf.mxu1  ;;  %v3476_v40 = vld [vmem:[#allocation2 + $0x68] sm:$0xff]  }
 0x291   :  { %3023 = vst [vmem:[#allocation2 + $0x70] sm:$0xff] %v2908_v53   ;;  %v4012_v63 = vadd.f32 %v3259_v54, %v3258_v50  ;;  %v3478_v53 = vld [vmem:[#allocation2 + $0x60] sm:$0xff]   ;;  %v3480_v54 = vld [vmem:[#allocation2 + $0x58] sm:$0xff]  }
 0x292   :  { %v3261_v55 = vpop.f32.mrf.mxu1  ;;  %v3479_v50 = vld [vmem:[#allocation2 + $0x20] sm:$0xff]  }
 0x294   :  { %v3262_v62 = vpop.f32.mrf.mxu1 }
 0x295   :  { %v4014_v26 = vadd.f32 %v3262_v62, %v3261_v55  ;;  %v3481_v55 = vld [vmem:[#allocation2 + $0x18] sm:$0xff]   ;;  %v3482_v62 = vld [vmem:[#allocation2 + $0x50] sm:$0xff]  }
 0x297   :  { %4301 = vst [vmem:[#allocation17_spill] sm:$0xff] %v4014_v26  ;;  %v2913_v32 = vpack.c.bf16 %v4014_v26, %v4012_v63 }
 0x298   :  { %v3474_v34 = vld [vmem:[#allocation2 + $0x70] sm:$0xff]  }
 0x299   :  { %3024 = vst [vmem:[#allocation2 + $0x78] sm:$0xff] %v2913_v32   ;;  %v3483_v32 = vld [vmem:[#allocation2 + $0x10] sm:$0xff]  }
 0x2a0   :  { %v3472_v24 = vld [vmem:[#allocation2 + $0x78] sm:$0xff]  }
 0x2a1   :  { %3264 = vmatprep.subr.bf16.mxu0 %v3472_v24  ;;  %v3484_v24 = vld [vmem:[#allocation2 + $0x48] sm:$0xff]  }
 0x2a2   :  { %3265 = vmatpush3.bf16.msra.mxu0 %v3473_v13  ;;  %v3485_v13 = vld [vmem:[#allocation2 + $0x8] sm:$0xff]  }
 0x2a3   :  { %3266 = vmatprep.subr.bf16.mxu0 %v3474_v34  ;;  %v3486_v34 = vld [vmem:[#allocation2 + $0x40] sm:$0xff]  }
 0x2a6   :  { %3267 = vmatpush3.bf16.msra.mxu0 %v3475_v35  ;;  %v3487_v35 = vld [vmem:[#allocation2] sm:$0xff]  }
 0x2a7   :  { %3268 = vmatprep.subr.bf16.mxu0 %v3476_v40  ;;  %v3488_v40 = vld [vmem:[%s4272_s0] ss:$8 sps:$4 sm:$0xff]  }
 0x2aa   :  { %3269 = vmatpush3.bf16.msra.mxu0 %v3477_v41  ;;  %v3491_v41 = vld [vmem:[%s4272_s0 + $0x14] ss:$8 sps:$4 sm:$0xff]  }
 0x2ab   :  { %3270 = vmatprep.subr.bf16.mxu0 %v3478_v53  ;;  %v3493_v53 = vld [vmem:[%s4272_s0 + $0x10] ss:$8 sps:$4 sm:$0xff]  }
 0x2ae   :  { %3271 = vmatpush3.bf16.msra.mxu0 %v3479_v50  ;;  %v3494_v50 = vld [vmem:[%s4272_s0 + $0x24] ss:$8 sps:$4 sm:$0xff]  }
 0x2af   :  { %3272 = vmatprep.subr.bf16.mxu0 %v3480_v54  ;;  %v3496_v54 = vld [vmem:[%s4272_s0 + $0x20] ss:$8 sps:$4 sm:$0xff]  }
 0x2b2   :  { %3273 = vmatpush3.bf16.msra.mxu0 %v3481_v55  ;;  %v3497_v55 = vld [vmem:[%s4272_s0 + $0x34] ss:$8 sps:$4 sm:$0xff]  }
 0x2b3   :  { %3274 = vmatprep.subr.bf16.mxu0 %v3482_v62  ;;  %v3499_v62 = vld [vmem:[%s4272_s0 + $0x30] ss:$8 sps:$4 sm:$0xff]  }
 0x2b6   :  { %3275 = vmatpush3.bf16.msra.mxu0 %v3483_v32  ;;  %v3500_v32 = vld [vmem:[%s4272_s0 + $0x44] ss:$8 sps:$4 sm:$0xff]  }
 0x2b7   :  { %3276 = vmatprep.subr.bf16.mxu0 %v3484_v24  ;;  %v3502_v24 = vld [vmem:[%s4272_s0 + $0x40] ss:$8 sps:$4 sm:$0xff]  }
 0x2ba   :  { %3277 = vmatpush3.bf16.msra.mxu0 %v3485_v13  ;;  %v3503_v13 = vld [vmem:[%s4272_s0 + $0x54] ss:$8 sps:$4 sm:$0xff]  }
 0x2bb   :  { %3278 = vmatprep.subr.bf16.mxu0 %v3486_v34  ;;  %v3505_v34 = vld [vmem:[%s4272_s0 + $0x50] ss:$8 sps:$4 sm:$0xff]  }
 0x2be   :  { %3279 = vmatpush3.bf16.msra.mxu0 %v3487_v35  ;;  %v3506_v35 = vld [vmem:[%s4272_s0 + $0x64] ss:$8 sps:$4 sm:$0xff]  }
 0x2c1   :  { %1935 = vmatmul.mubr.bf16.vlgmr.msra.gmra.mxu0 %v3488_v40  ;;  %v3508_v40 = vld [vmem:[%s4272_s0 + $0x60] ss:$8 sps:$4 sm:$0xff]  }
 0x2c2   :  { %1942 = vmatprep.mubr.bf16.mxu0 %v3491_v41  ;;  %v3509_v41 = vld [vmem:[%s4272_s0 + $0x74] ss:$8 sps:$4 sm:$0xff]  }
 0x2c9   :  { %1943 = vmatmul.mubr.bf16.gmra.mxu0 %v3493_v53  ;;  %v3511_v53 = vld [vmem:[%s4272_s0 + $0x70] ss:$8 sps:$4 sm:$0xff]  }
 0x2ca   :  { %1950 = vmatprep.mubr.bf16.mxu0 %v3494_v50  ;;  %v3512_v50 = vld [vmem:[%s4272_s0 + $0x84] ss:$8 sps:$4 sm:$0xff]  }
 0x2d1   :  { %1951 = vmatmul.mubr.bf16.gmra.mxu0 %v3496_v54  ;;  %v3514_v54 = vld [vmem:[%s4272_s0 + $0x80] ss:$8 sps:$4 sm:$0xff]  }
 0x2d2   :  { %1958 = vmatprep.mubr.bf16.mxu0 %v3497_v55  ;;  %v3515_v55 = vld [vmem:[%s4272_s0 + $0x94] ss:$8 sps:$4 sm:$0xff]  }
 0x2d9   :  { %1959 = vmatmul.mubr.bf16.gmra.mxu0 %v3499_v62  ;;  %v3517_v62 = vld [vmem:[%s4272_s0 + $0x90] ss:$8 sps:$4 sm:$0xff]  }
 0x2da   :  { %1966 = vmatprep.mubr.bf16.mxu0 %v3500_v32  ;;  %v3518_v32 = vld [vmem:[%s4272_s0 + $0xa4] ss:$8 sps:$4 sm:$0xff]  }
 0x2e1   :  { %1967 = vmatmul.mubr.bf16.gmra.mxu0 %v3502_v24  ;;  %v3520_v24 = vld [vmem:[%s4272_s0 + $0xa0] ss:$8 sps:$4 sm:$0xff]  }
 0x2e2   :  { %1974 = vmatprep.mubr.bf16.mxu0 %v3503_v13  ;;  %v3521_v13 = vld [vmem:[%s4272_s0 + $0xb4] ss:$8 sps:$4 sm:$0xff]  }
 0x2e9   :  { %1975 = vmatmul.mubr.bf16.gmra.mxu0 %v3505_v34  ;;  %v3523_v34 = vld [vmem:[%s4272_s0 + $0xb0] ss:$8 sps:$4 sm:$0xff]  }
 0x2ea   :  { %1982 = vmatprep.mubr.bf16.mxu0 %v3506_v35  ;;  %v3524_v35 = vld [vmem:[%s4272_s0 + $0xc4] ss:$8 sps:$4 sm:$0xff]  }
 0x2f1   :  { %1983 = vmatmul.mubr.bf16.gmra.mxu0 %v3508_v40  ;;  %v3526_v40 = vld [vmem:[%s4272_s0 + $0xc0] ss:$8 sps:$4 sm:$0xff]  }
 0x2f2   :  { %1990 = vmatprep.mubr.bf16.mxu0 %v3509_v41  ;;  %v3527_v41 = vld [vmem:[%s4272_s0 + $0xd4] ss:$8 sps:$4 sm:$0xff]  }
 0x2f9   :  { %1991 = vmatmul.mubr.bf16.gmra.mxu0 %v3511_v53  ;;  %v3529_v53 = vld [vmem:[%s4272_s0 + $0xd0] ss:$8 sps:$4 sm:$0xff]  }
 0x2fa   :  { %1998 = vmatprep.mubr.bf16.mxu0 %v3512_v50  ;;  %v3530_v50 = vld [vmem:[%s4272_s0 + $0xe4] ss:$8 sps:$4 sm:$0xff]  }
 0x301   :  { %1999 = vmatmul.mubr.bf16.gmra.mxu0 %v3514_v54  ;;  %v3532_v54 = vld [vmem:[%s4272_s0 + $0xe0] ss:$8 sps:$4 sm:$0xff]  }
 0x302   :  { %2006 = vmatprep.mubr.bf16.mxu0 %v3515_v55  ;;  %v3533_v55 = vld [vmem:[%s4272_s0 + $0xf4] ss:$8 sps:$4 sm:$0xff]  }
 0x309   :  { %2007 = vmatmul.mubr.bf16.gmra.mxu0 %v3517_v62  ;;  %v3535_v62 = vld [vmem:[%s4272_s0 + $0xf0] ss:$8 sps:$4 sm:$0xff]  }
 0x30a   :  { %2014 = vmatprep.mubr.bf16.mxu0 %v3518_v32 }
 0x311   :  { %2015 = vmatmul.mubr.bf16.gmra.mxu0 %v3520_v24 }
 0x312   :  { %2022 = vmatprep.mubr.bf16.mxu0 %v3521_v13  ;;  %v1358_v13 = vadd.f32 %v3919_v37, %v3792_v8  ;;  %v1360_v8 = vadd.f32 %v3925_v44, %v3804_v23 }
 0x319   :  { %2023 = vmatmul.mubr.bf16.gmra.mxu0 %v3523_v34 }
 0x31a   :  { %2030 = vmatprep.mubr.bf16.mxu0 %v3524_v35 }
 0x321   :  { %2031 = vmatmul.mubr.bf16.gmra.mxu0 %v3526_v40 }
 0x322   :  { %2038 = vmatprep.mubr.bf16.mxu0 %v3527_v41 }
 0x329   :  { %2039 = vmatmul.mubr.bf16.gmra.mxu0 %v3529_v53  ;;  %v1359_v53 = vadd.f32 %v3921_v38, %v3796_v10 }
 0x32a   :  { %2046 = vmatprep.mubr.bf16.mxu0 %v3530_v50 }
 0x331   :  { %2047 = vmatmul.mubr.bf16.gmra.mxu0 %v3532_v54 }
 0x332   :  { %2054 = vmatprep.mubr.bf16.mxu0 %v3533_v55 }
 0x339   :  { %2055 = vmatmul.mubr.bf16.gmra.mxu0 %v3535_v62 }
 0x381   :  { %v3280_v32 = vpop.f32.mrf.mxu0 }
 0x383   :  { %v3281_v24 = vpop.f32.mrf.mxu0 }
 0x384   :  { %v3282_v34 = vadd.f32 %v3281_v24, %v3280_v32 }
 0x385   :  { %v3283_v35 = vpop.f32.mrf.mxu0 }
 0x386   :  { %v2095_v40 = vadd.f32 %v3282_v34, %v1358_v13  ;;  %v1361_v13 = vadd.f32 %v3927_v45, %v3808_v25 }
 0x387   :  { %v3284_v41 = vpop.f32.mrf.mxu0 }
 0x388   :  { %v2351_v50 = vmul.f32 0.33333334, %v2095_v40  ;;  %v3285_v54 = vadd.f32 %v3284_v41, %v3283_v35 }
 0x389   :  { %v3286_v55 = vpop.f32.mrf.mxu0 }
 0x38a   :  { %2383 = vst [vmem:[%s4273_s2] sm:$0xff] %v2351_v50  ;;  %v2096_v62 = vadd.f32 %v3285_v54, %v1359_v53  ;;  %v2918_v26 = vpack.c.bf16 %v3285_v54, %v3282_v34  ;;  %v1363_v54 = vadd.f32 %v3933_v52, %v3820_v5 }
 0x38b   :  { %v3287_v20 = vpop.f32.mrf.mxu0 }
 0x38c   :  { %2919 = vst [vmem:[#allocation2] sm:$0xff] %v2918_v26   ;;  %v2352_v37 = vmul.f32 0.33333334, %v2096_v62  ;;  %v3288_v32 = vadd.f32 %v3287_v20, %v3286_v55  ;;  %v1362_v26 = vadd.f32 %v3931_v51, %v3816_v3 }
 0x38d   :  { %v3289_v24 = vpop.f32.mrf.mxu0 }
 0x38e   :  { %2384 = vst [vmem:[%s4273_s2 + $0x8] sm:$0xff] %v2352_v37  ;;  %v2097_v10 = vadd.f32 %v3288_v32, %v1360_v8 }
 0x38f   :  { %v3290_v38 = vpop.f32.mrf.mxu0 }
 0x390   :  { %v2353_v35 = vmul.f32 0.33333334, %v2097_v10  ;;  %v3291_v40 = vadd.f32 %v3290_v38, %v3289_v24 }
 0x391   :  { %v3292_v34 = vpop.f32.mrf.mxu0 }
 0x392   :  { %2385 = vst [vmem:[%s4273_s2 + $0x10] sm:$0xff] %v2353_v35  ;;  %v2098_v23 = vadd.f32 %v3291_v40, %v1361_v13  ;;  %v2923_v44 = vpack.c.bf16 %v3291_v40, %v3288_v32  ;;  %v1364_v32 = vadd.f32 %v3937_v58, %v3828_v22  ;;  %v1365_v13 = vadd.f32 %v3939_v59, %v3832_v28 }
 0x393   :  { %v3293_v20 = vpop.f32.mrf.mxu0 }
 0x394   :  { %3025 = vst [vmem:[#allocation2 + $0x8] sm:$0xff] %v2923_v44   ;;  %v2354_v41 = vmul.f32 0.33333334, %v2098_v23  ;;  %v3294_v53 = vadd.f32 %v3293_v20, %v3292_v34  ;;  %v1366_v44 = vadd.f32 %v3943_v4, %v3840_v14 }
 0x395   :  { %v3295_v50 = vpop.f32.mrf.mxu0 }
 0x396   :  { %2386 = vst [vmem:[%s4273_s2 + $0x18] sm:$0xff] %v2354_v41  ;;  %v2099_v25 = vadd.f32 %v3294_v53, %v1362_v26 }
 0x397   :  { %v3296_v45 = vpop.f32.mrf.mxu0 }
 0x398   :  { %v2355_v55 = vmul.f32 0.33333334, %v2099_v25  ;;  %v3297_v62 = vadd.f32 %v3296_v45, %v3295_v50 }
 0x399   :  { %v3298_v8 = vpop.f32.mrf.mxu0 }
 0x39a   :  { %2387 = vst [vmem:[%s4273_s2 + $0x20] sm:$0xff] %v2355_v55  ;;  %v2100_v3 = vadd.f32 %v3297_v62, %v1363_v54  ;;  %v2928_v51 = vpack.c.bf16 %v3297_v62, %v3294_v53  ;;  %v1367_v53 = vadd.f32 %v3945_v7, %v3844_v16  ;;  %v1368_v55 = vadd.f32 %v3952_v15, %v3852_v2 }
 0x39b   :  { %v3299_v37 = vpop.f32.mrf.mxu0 }
 0x39c   :  { %3026 = vst [vmem:[#allocation2 + $0x10] sm:$0xff] %v2928_v51   ;;  %v2356_v24 = vmul.f32 0.33333334, %v2100_v3  ;;  %v3300_v10 = vadd.f32 %v3299_v37, %v3298_v8  ;;  %v1369_v51 = vadd.f32 %v3954_v0, %v3856_v12 }
 0x39d   :  { %v3301_v38 = vpop.f32.mrf.mxu0 }
 0x39e   :  { %2388 = vst [vmem:[%s4273_s2 + $0x28] sm:$0xff] %v2356_v24  ;;  %v2101_v5 = vadd.f32 %v3300_v10, %v1364_v32 }
 0x39f   :  { %v3302_v52 = vpop.f32.mrf.mxu0 }
 0x3a0   :  { %v2357_v35 = vmul.f32 0.33333334, %v2101_v5  ;;  %v3303_v40 = vadd.f32 %v3302_v52, %v3301_v38  ;;  %v1370_v38 = vadd.f32 %v3958_v36, %v3864_v30 }
 0x3a1   :  { %v3304_v34 = vpop.f32.mrf.mxu0 }
 0x3a2   :  { %2389 = vst [vmem:[%s4273_s2 + $0x30] sm:$0xff] %v2357_v35  ;;  %v2102_v22 = vadd.f32 %v3303_v40, %v1365_v13  ;;  %v2933_v58 = vpack.c.bf16 %v3303_v40, %v3300_v10  ;;  %v1371_v35 = vadd.f32 %v3960_v39, %v3868_v31 }
 0x3a3   :  { %v3305_v23 = vpop.f32.mrf.mxu0 }
 0x3a4   :  { %3027 = vst [vmem:[#allocation2 + $0x18] sm:$0xff] %v2933_v58   ;;  %v2358_v20 = vmul.f32 0.33333334, %v2102_v22  ;;  %v3306_v26 = vadd.f32 %v3305_v23, %v3304_v34  ;;  %v1372_v23 = vadd.f32 %v3964_v47, %v3876_v19 }
 0x3a5   :  { %v3307_v41 = vpop.f32.mrf.mxu0 }
 0x3a6   :  { %2390 = vst [vmem:[%s4273_s2 + $0x38] sm:$0xff] %v2358_v20  ;;  %v2103_v28 = vadd.f32 %v3306_v26, %v1366_v44 }
 0x3a7   :  { %v3308_v59 = vpop.f32.mrf.mxu0 }
 0x3a8   :  { %v2359_v50 = vmul.f32 0.33333334, %v2103_v28  ;;  %v3309_v25 = vadd.f32 %v3308_v59, %v3307_v41  ;;  %v1373_v41 = vadd.f32 %v3966_v48, %v3880_v29 }
 0x3a9   :  { %v3310_v45 = vpop.f32.mrf.mxu0 }
 0x3aa   :  { %2391 = vst [vmem:[%s4273_s2 + $0x40] sm:$0xff] %v2359_v50  ;;  %v2104_v14 = vadd.f32 %v3309_v25, %v1367_v53  ;;  %v2938_v4 = vpack.c.bf16 %v3309_v25, %v3306_v26  ;;  %v1374_v25 = vadd.f32 %v3970_v56, %v3794_v9 }
 0x3ab   :  { %v3311_v54 = vpop.f32.mrf.mxu0 }
 0x3ac   :  { %3028 = vst [vmem:[#allocation2 + $0x20] sm:$0xff] %v2938_v4   ;;  %v2360_v62 = vmul.f32 0.33333334, %v2104_v14  ;;  %v3312_v8 = vadd.f32 %v3311_v54, %v3310_v45  ;;  %v1375_v54 = vadd.f32 %v3972_v57, %v3798_v11 }
 0x3ad   :  { %v3313_v3 = vpop.f32.mrf.mxu0 }
 0x3ae   :  { %2392 = vst [vmem:[%s4273_s2 + $0x48] sm:$0xff] %v2360_v62  ;;  %v2105_v16 = vadd.f32 %v3312_v8, %v1368_v55 }
 0x3af   :  { %v3314_v7 = vpop.f32.mrf.mxu0 }
 0x3b0   :  { %v2361_v37 = vmul.f32 0.33333334, %v2105_v16  ;;  %v3315_v32 = vadd.f32 %v3314_v7, %v3313_v3  ;;  %v4302_v16 = vld [vmem:[#allocation4_spill] sm:$0xff] }
 0x3b1   :  { %v3316_v24 = vpop.f32.mrf.mxu0  ;;  %v1376_v7 = vadd.f32 %v3976_v21, %v4302_v16 }
 0x3b2   :  { %2393 = vst [vmem:[%s4273_s2 + $0x50] sm:$0xff] %v2361_v37  ;;  %v2106_v2 = vadd.f32 %v3315_v32, %v1369_v51  ;;  %v2943_v15 = vpack.c.bf16 %v3315_v32, %v3312_v8 }
 0x3b3   :  { %v3317_v10 = vpop.f32.mrf.mxu0 }
 0x3b4   :  { %3029 = vst [vmem:[#allocation2 + $0x28] sm:$0xff] %v2943_v15   ;;  %v2362_v5 = vmul.f32 0.33333334, %v2106_v2  ;;  %v3318_v52 = vadd.f32 %v3317_v10, %v3316_v24  ;;  %v4303_v24 = vld [vmem:[#allocation5_spill] sm:$0xff] }
 0x3b5   :  { %v3319_v13 = vpop.f32.mrf.mxu0  ;;  %v1377_v2 = vadd.f32 %v3978_v27, %v4303_v24 }
 0x3b6   :  { %2394 = vst [vmem:[%s4273_s2 + $0x58] sm:$0xff] %v2362_v5  ;;  %v2107_v12 = vadd.f32 %v3318_v52, %v1370_v38 }
 0x3b7   :  { %v3320_v0 = vpop.f32.mrf.mxu0 }
 0x3b8   :  { %v2363_v40 = vmul.f32 0.33333334, %v2107_v12  ;;  %v3321_v34 = vadd.f32 %v3320_v0, %v3319_v13  ;;  %v4304_v13 = vld [vmem:[#allocation6_spill] sm:$0xff] }
 0x3b9   :  { %v3322_v22 = vpop.f32.mrf.mxu0  ;;  %v1378_v12 = vadd.f32 %v3982_v18, %v4304_v13 }
 0x3ba   :  { %2395 = vst [vmem:[%s4273_s2 + $0x60] sm:$0xff] %v2363_v40  ;;  %v2108_v30 = vadd.f32 %v3321_v34, %v1371_v35  ;;  %v2948_v36 = vpack.c.bf16 %v3321_v34, %v3318_v52 }
 0x3bb   :  { %v3323_v58 = vpop.f32.mrf.mxu0 }
 0x3bc   :  { %3030 = vst [vmem:[#allocation2 + $0x30] sm:$0xff] %v2948_v36   ;;  %v2364_v44 = vmul.f32 0.33333334, %v2108_v30  ;;  %v3324_v20 = vadd.f32 %v3323_v58, %v3322_v22  ;;  %v4305_v22 = vld [vmem:[#allocation7_spill] sm:$0xff] }
 0x3bd   :  { %v3325_v26 = vpop.f32.mrf.mxu0  ;;  %v1379_v30 = vadd.f32 %v3984_v17, %v4305_v22  ;;  %v4313_v22 = vld [vmem:[#allocation15_spill] sm:$0xff] }
 0x3be   :  { %2396 = vst [vmem:[%s4273_s2 + $0x68] sm:$0xff] %v2364_v44  ;;  %v2109_v31 = vadd.f32 %v3324_v20, %v1372_v23 }
 0x3bf   :  { %v3326_v39 = vpop.f32.mrf.mxu0 }
 0x3c0   :  { %v2365_v28 = vmul.f32 0.33333334, %v2109_v31  ;;  %v3327_v59 = vadd.f32 %v3326_v39, %v3325_v26  ;;  %v4306_v26 = vld [vmem:[#allocation8_spill] sm:$0xff] }
 0x3c1   :  { %v3328_v53 = vpop.f32.mrf.mxu0  ;;  %v1380_v31 = vadd.f32 %v3988_v43, %v4306_v26 }
 0x3c2   :  { %2397 = vst [vmem:[%s4273_s2 + $0x70] sm:$0xff] %v2365_v28  ;;  %v2110_v19 = vadd.f32 %v3327_v59, %v1373_v41  ;;  %v2953_v47 = vpack.c.bf16 %v3327_v59, %v3324_v20 }
 0x3c3   :  { %v3329_v50 = vpop.f32.mrf.mxu0 }
 0x3c4   :  { %3031 = vst [vmem:[#allocation2 + $0x38] sm:$0xff] %v2953_v47   ;;  %v2366_v45 = vmul.f32 0.33333334, %v2110_v19  ;;  %v3330_v14 = vadd.f32 %v3329_v50, %v3328_v53  ;;  %v4307_v53 = vld [vmem:[#allocation9_spill] sm:$0xff] }
 0x3c5   :  { %v3331_v4 = vpop.f32.mrf.mxu0  ;;  %v1381_v19 = vadd.f32 %v3990_v46, %v4307_v53 }
 0x3c6   :  { %2398 = vst [vmem:[%s4273_s2 + $0x78] sm:$0xff] %v2366_v45  ;;  %v2111_v29 = vadd.f32 %v3330_v14, %v1374_v25 }
 0x3c7   :  { %v3332_v48 = vpop.f32.mrf.mxu0 }
 0x3c8   :  { %v2367_v55 = vmul.f32 0.33333334, %v2111_v29  ;;  %v3333_v62 = vadd.f32 %v3332_v48, %v3331_v4  ;;  %v4308_v4 = vld [vmem:[#allocation10_spill] sm:$0xff] }
 0x3c9   :  { %v3334_v8 = vpop.f32.mrf.mxu0  ;;  %v1382_v29 = vadd.f32 %v3994_v60, %v4308_v4 }
 0x3ca   :  { %2399 = vst [vmem:[%s4273_s2 + $0x80] sm:$0xff] %v2367_v55  ;;  %v2112_v9 = vadd.f32 %v3333_v62, %v1375_v54  ;;  %v2958_v56 = vpack.c.bf16 %v3333_v62, %v3330_v14 }
 0x3cb   :  { %v3335_v3 = vpop.f32.mrf.mxu0 }
 0x3cc   :  { %3032 = vst [vmem:[#allocation2 + $0x40] sm:$0xff] %v2958_v56   ;;  %v2368_v51 = vmul.f32 0.33333334, %v2112_v9  ;;  %v3336_v37 = vadd.f32 %v3335_v3, %v3334_v8  ;;  %v4309_v8 = vld [vmem:[#allocation11_spill] sm:$0xff] }
 0x3cd   :  { %v3337_v32 = vpop.f32.mrf.mxu0  ;;  %v1383_v9 = vadd.f32 %v3996_v61, %v4309_v8 }
 0x3ce   :  { %2400 = vst [vmem:[%s4273_s2 + $0x88] sm:$0xff] %v2368_v51  ;;  %v2113_v11 = vadd.f32 %v3336_v37, %v1376_v7 }
 0x3cf   :  { %v3338_v57 = vpop.f32.mrf.mxu0 }
 0x3d0   :  { %v2369_v15 = vmul.f32 0.33333334, %v2113_v11  ;;  %v3339_v10 = vadd.f32 %v3338_v57, %v3337_v32 }
 0x3d1   :  { %v3340_v38 = vpop.f32.mrf.mxu0 }
 0x3d2   :  { %2401 = vst [vmem:[%s4273_s2 + $0x90] sm:$0xff] %v2369_v15  ;;  %v2114_v21 = vadd.f32 %v3339_v10, %v1377_v2  ;;  %v2963_v5 = vpack.c.bf16 %v3339_v10, %v3336_v37  ;;  %v4310_v37 = vld [vmem:[#allocation12_spill] sm:$0xff]  ;;  %v4311_v15 = vld [vmem:[#allocation13_spill] sm:$0xff] }
 0x3d3   :  { %v3341_v52 = vpop.f32.mrf.mxu0  ;;  %v1384_v32 = vadd.f32 %v4000_v1, %v4310_v37  ;;  %v1385_v10 = vadd.f32 %v4002_v6, %v4311_v15 }
 0x3d4   :  { %3033 = vst [vmem:[#allocation2 + $0x48] sm:$0xff] %v2963_v5   ;;  %v2370_v0 = vmul.f32 0.33333334, %v2114_v21  ;;  %v3342_v35 = vadd.f32 %v3341_v52, %v3340_v38 }
 0x3d5   :  { %v3343_v40 = vpop.f32.mrf.mxu0 }
 0x3d6   :  { %2402 = vst [vmem:[%s4273_s2 + $0x98] sm:$0xff] %v2370_v0  ;;  %v2115_v27 = vadd.f32 %v3342_v35, %v1378_v12  ;;  %v4312_v12 = vld [vmem:[#allocation14_spill] sm:$0xff] }
 0x3d7   :  { %v3344_v34 = vpop.f32.mrf.mxu0  ;;  %v1386_v0 = vadd.f32 %v4006_v42, %v4312_v12 }
 0x3d8   :  { %v2371_v36 = vmul.f32 0.33333334, %v2115_v27  ;;  %v3345_v58 = vadd.f32 %v3344_v34, %v3343_v40 }
 0x3d9   :  { %v3346_v23 = vpop.f32.mrf.mxu0 }
 0x3da   :  { %2403 = vst [vmem:[%s4273_s2 + $0xa0] sm:$0xff] %v2371_v36  ;;  %v2116_v18 = vadd.f32 %v3345_v58, %v1379_v30  ;;  %v2968_v44 = vpack.c.bf16 %v3345_v58, %v3342_v35  ;;  %v1387_v30 = vadd.f32 %v4008_v49, %v4313_v22 }
 0x3db   :  { %v3347_v20 = vpop.f32.mrf.mxu0 }
 0x3dc   :  { %3034 = vst [vmem:[#allocation2 + $0x50] sm:$0xff] %v2968_v44   ;;  %v2372_v39 = vmul.f32 0.33333334, %v2116_v18  ;;  %v3348_v41 = vadd.f32 %v3347_v20, %v3346_v23  ;;  %v1388_v20 = vadd.f32 %v4012_v63, %v3878_v33 }
 0x3dd   :  { %v3349_v28 = vpop.f32.mrf.mxu0 }
 0x3de   :  { %2404 = vst [vmem:[%s4273_s2 + $0xa8] sm:$0xff] %v2372_v39  ;;  %v2117_v17 = vadd.f32 %v3348_v41, %v1380_v31 }
 0x3df   :  { %v3350_v59 = vpop.f32.mrf.mxu0 }
 0x3e0   :  { %v2373_v47 = vmul.f32 0.33333334, %v2117_v17  ;;  %v3351_v50 = vadd.f32 %v3350_v59, %v3349_v28  ;;  %v4314_v28 = vld [vmem:[#allocation16_spill] sm:$0xff]  ;;  %v4315_v17 = vld [vmem:[#allocation17_spill] sm:$0xff] }
 0x3e1   :  { %v3352_v25 = vpop.f32.mrf.mxu0  ;;  %v1389_v59 = vadd.f32 %v4315_v17, %v4314_v28 }
 0x3e2   :  { %2405 = vst [vmem:[%s4273_s2 + $0xb0] sm:$0xff] %v2373_v47  ;;  %v2118_v43 = vadd.f32 %v3351_v50, %v1381_v19  ;;  %v2973_v45 = vpack.c.bf16 %v3351_v50, %v3348_v41 }
 0x3e3   :  { %v3353_v14 = vpop.f32.mrf.mxu0 }
 0x3e4   :  { %3035 = vst [vmem:[#allocation2 + $0x58] sm:$0xff] %v2973_v45   ;;  %v2374_v48 = vmul.f32 0.33333334, %v2118_v43  ;;  %v3354_v54 = vadd.f32 %v3353_v14, %v3352_v25 }
 0x3e5   :  { %v3355_v55 = vpop.f32.mrf.mxu0 }
 0x3e6   :  { %2406 = vst [vmem:[%s4273_s2 + $0xb8] sm:$0xff] %v2374_v48  ;;  %v2119_v46 = vadd.f32 %v3354_v54, %v1382_v29 }
 0x3e7   :  { %v3356_v62 = vpop.f32.mrf.mxu0 }
 0x3e8   :  { %v2375_v56 = vmul.f32 0.33333334, %v2119_v46  ;;  %v3357_v3 = vadd.f32 %v3356_v62, %v3355_v55 }
 0x3e9   :  { %v3358_v16 = vpop.f32.mrf.mxu0 }
 0x3ea   :  { %2407 = vst [vmem:[%s4273_s2 + $0xc0] sm:$0xff] %v2375_v56  ;;  %v2120_v60 = vadd.f32 %v3357_v3, %v1383_v9  ;;  %v2978_v7 = vpack.c.bf16 %v3357_v3, %v3354_v54 }
 0x3eb   :  { %v3359_v51 = vpop.f32.mrf.mxu0 }
 0x3ec   :  { %3036 = vst [vmem:[#allocation2 + $0x60] sm:$0xff] %v2978_v7   ;;  %v2376_v11 = vmul.f32 0.33333334, %v2120_v60  ;;  %v3360_v57 = vadd.f32 %v3359_v51, %v3358_v16 }
 0x3ed   :  { %v3361_v24 = vpop.f32.mrf.mxu0 }
 0x3ee   :  { %2408 = vst [vmem:[%s4273_s2 + $0xc8] sm:$0xff] %v2376_v11  ;;  %v2121_v61 = vadd.f32 %v3360_v57, %v1384_v32 }
 0x3ef   :  { %v3362_v2 = vpop.f32.mrf.mxu0 }
 0x3f0   :  { %v2377_v38 = vmul.f32 0.33333334, %v2121_v61  ;;  %v3363_v21 = vadd.f32 %v3362_v2, %v3361_v24 }
 0x3f1   :  { %v3364_v5 = vpop.f32.mrf.mxu0 }
 0x3f2   :  { %2409 = vst [vmem:[%s4273_s2 + $0xd0] sm:$0xff] %v2377_v38  ;;  %v2122_v1 = vadd.f32 %v3363_v21, %v1385_v10  ;;  %v2983_v52 = vpack.c.bf16 %v3363_v21, %v3360_v57 }
 0x3f3   :  { %v3365_v13 = vpop.f32.mrf.mxu0 }
 0x3f4   :  { %3037 = vst [vmem:[#allocation2 + $0x68] sm:$0xff] %v2983_v52   ;;  %v2378_v35 = vmul.f32 0.33333334, %v2122_v1  ;;  %v3366_v40 = vadd.f32 %v3365_v13, %v3364_v5 }
 0x3f5   :  { %v3367_v27 = vpop.f32.mrf.mxu0 }
 0x3f6   :  { %2410 = vst [vmem:[%s4273_s2 + $0xd8] sm:$0xff] %v2378_v35  ;;  %v2123_v6 = vadd.f32 %v3366_v40, %v1386_v0 }
 0x3f7   :  { %v3368_v34 = vpop.f32.mrf.mxu0 }
 0x3f8   :  { %v2379_v36 = vmul.f32 0.33333334, %v2123_v6  ;;  %v3369_v58 = vadd.f32 %v3368_v34, %v3367_v27 }
 0x3f9   :  { %v3370_v23 = vpop.f32.mrf.mxu0 }
 0x3fa   :  { %2411 = vst [vmem:[%s4273_s2 + $0xe0] sm:$0xff] %v2379_v36  ;;  %v2124_v42 = vadd.f32 %v3369_v58, %v1387_v30  ;;  %v2988_v18 = vpack.c.bf16 %v3369_v58, %v3366_v40 }
 0x3fb   :  { %v3371_v44 = vpop.f32.mrf.mxu0 }
 0x3fc   :  { %3038 = vst [vmem:[#allocation2 + $0x70] sm:$0xff] %v2988_v18   ;;  %v2380_v26 = vmul.f32 0.33333334, %v2124_v42  ;;  %v3372_v31 = vadd.f32 %v3371_v44, %v3370_v23 }
 0x3fd   :  { %v3373_v39 = vpop.f32.mrf.mxu0 }
 0x3fe   :  { %2412 = vst [vmem:[%s4273_s2 + $0xe8] sm:$0xff] %v2380_v26  ;;  %v2125_v49 = vadd.f32 %v3372_v31, %v1388_v20 }
 0x3ff   :  { %v3374_v41 = vpop.f32.mrf.mxu0 }
 0x400   :  { %v2381_v53 = vmul.f32 0.33333334, %v2125_v49  ;;  %v3375_v19 = vadd.f32 %v3374_v41, %v3373_v39 }
 0x402   :  { %2413 = vst [vmem:[%s4273_s2 + $0xf0] sm:$0xff] %v2381_v53  ;;  %v2126_v33 = vadd.f32 %v3375_v19, %v1389_v59  ;;  %v2993_v63 = vpack.c.bf16 %v3375_v19, %v3372_v31 }
 0x404   :  { %3039 = vst [vmem:[#allocation2 + $0x78] sm:$0xff] %v2993_v63   ;;  %v2382_v47 = vmul.f32 0.33333334, %v2126_v33 }
 0x406   :  { %2414 = vst [vmem:[%s4273_s2 + $0xf8] sm:$0xff] %v2382_v47 }

</bundles_post_ra>
